<compile_context>
chip_gen: v5e
topology: v5e:2x2
jax: 0.10.0
libtpu: 0.0.40
codegen_flags: <defaults>
</compile_context>

<pallas_src>
import jax
import jax.numpy as jnp
from jax.experimental import pallas as pl
from jax.experimental.pallas import tpu as pltpu

NEG_SLOPE = 0.01        # F.leaky_relu default negative_slope
LANE = 128              # TPU lane width
MXU_M = 256             # MXU M rounding target (multiple of 128 -> fine on v5e too)


def _leaky_relu(v):
    return jnp.where(v >= 0, v, NEG_SLOPE * v)


def _round_up(a, m):
    return ((a + m - 1) // m) * m


def _min_sublane(dtype):
    # Min sublane packing: 8 for 32-bit, 16 for bf16, 32 for int8/fp8.
    bits = jnp.dtype(dtype).itemsize * 8
    return max(8, 256 // bits)


def _vmem_budget_bytes():
    """Per-core VMEM capacity and the fraction of it we allow the kernel to use."""
    cap = 64 * 1024 * 1024   # conservative default = v7x per-TensorCore VMEM
    try:
        info = pltpu.get_tpu_info()
        cap = int(getattr(info, "vmem_capacity_bytes", cap) or cap)
    except Exception:
        pass
    return cap, int(cap * 0.85)


def make_fnn_kernel(num_layers, compute_dtype):
    """Fused N-layer MLP: per layer, h @ W (MXU, f32 acc) + b -> leaky_relu.

    Refs arrive as (x_ref, w1, b1, ..., wN, bN, o_ref).  Weights are in the MXU
    compute dtype (bf16 by default), biases are f32 (1, out); the epilogue
    (bias add + leaky_relu) runs in f32 on the VPU; dropout (eval) is identity.
    """

    def kernel(x_ref, *refs):
        o_ref = refs[-1]
        h = x_ref[...].astype(compute_dtype)
        for layer in range(num_layers):
            w = refs[2 * layer][...]            # (in, out), compute_dtype
            b = refs[2 * layer + 1][...]        # (1, out), f32 -- no per-step cast
            acc = jnp.dot(h, w, preferred_element_type=jnp.float32)
            acc = _leaky_relu(acc + b)          # f32 epilogue
            # dropout (eval mode) == identity
            if layer + 1 < num_layers:
                h = acc.astype(compute_dtype)   # back to MXU dtype for next layer
            else:
                o_ref[...] = acc.astype(o_ref.dtype)

    return kernel


def prepare_params(params, compute_dtype=jnp.bfloat16):
    """One-time conversion from nn.Linear layout (W:(out,in), b:(out,)) to the
    kernel layout: W:(in,out) in the MXU compute dtype, b:(1,out) f32, with
    hidden/output feature dims zero-padded to multiples of 128 (lane-dense
    stores).  Returns (kernel_params, out_features) where out_features is the
    logical (unpadded) width of the final layer."""
    kernel_params = []
    prev_pad = 0
    out_f = None
    for (w, b) in params:
        out_f, _ = w.shape
        wt = jnp.transpose(w)                         # (in, out)
        out_pad = (-out_f) % LANE
        if prev_pad or out_pad:
            wt = jnp.pad(wt, ((0, prev_pad), (0, out_pad)))
        bb = jnp.pad(b, (0, out_pad)) if out_pad else b
        kernel_params.append((wt.astype(compute_dtype),
                              bb.reshape(1, -1).astype(jnp.float32)))
        prev_pad = out_pad
    return kernel_params, out_f


def _split_for_capacity(layer_params):
    """Greedily group layers so each group's resident weights fit well in VMEM."""
    _, budget = _vmem_budget_bytes()
    limit = budget // 2
    groups, cur, cur_bytes = [], [], 0
    for (w, b) in layer_params:
        nb = w.size * w.dtype.itemsize + b.size * b.dtype.itemsize
        if cur and cur_bytes + nb > limit:
            groups.append(cur)
            cur, cur_bytes = [], 0
        cur.append((w, b))
        cur_bytes += nb
    if cur:
        groups.append(cur)
    # TODO(synk): a single layer larger than ~half of VMEM would still need a
    #             K/N-tiled matmul (reduction grid axis); not implemented.
    return groups


def _fused_forward(x, layer_params, *, block_m, out_features=None):
    """One fused pallas_call over a group of layers whose weights stay resident."""
    batch, in_dim = x.shape
    num_layers = len(layer_params)
    compute_dtype = layer_params[0][0].dtype
    out_dim = layer_params[-1][0].shape[1]
    out_dtype = x.dtype
    x_item = jnp.dtype(x.dtype).itemsize
    out_item = jnp.dtype(out_dtype).itemsize

    sub = _min_sublane(compute_dtype)
    cap, budget = _vmem_budget_bytes()

    # VMEM model: single-buffered resident weights (Buffered(1)) +
    # double-buffered x/out batch tiles + f32 layer intermediates.
    resident = sum(w.size * w.dtype.itemsize + b.size * b.dtype.itemsize
                   for (w, b) in layer_params)
    max_width = max(w.shape[1] for (w, _) in layer_params)
    per_row = 2 * (in_dim * x_item + out_dim * out_item)   # pipelined x/out tiles
    per_row += 2 * 4 * max_width                           # live f32 intermediates
    tm_cap = (budget - resident) // per_row if budget > resident else 0

    # Batch tile: derived from the VMEM budget, MXU-shaped when possible.
    block_m = max(block_m, sub)
    tm = min(block_m, max(tm_cap, sub), _round_up(batch, sub))
    if tm >= MXU_M and batch >= MXU_M:
        tm = (tm // MXU_M) * MXU_M
    else:
        tm = max(sub, (tm // sub) * sub)
    padded = _round_up(batch, tm)
    if padded != batch:
        x = jnp.pad(x, ((0, padded - batch), (0, 0)))
    grid = (padded // tm,)

    # x/out stream over the batch grid; weights/biases are VMEM-resident with
    # constant index_maps and a single buffer (no pointless double-buffering).
    in_specs = [pl.BlockSpec((tm, in_dim), lambda i: (i, 0))]
    flat_args = [x]
    for (w, b) in layer_params:
        in_specs.append(pl.BlockSpec(w.shape, lambda i: (0, 0),
                                     pipeline_mode=pl.Buffered(1)))
        in_specs.append(pl.BlockSpec(b.shape, lambda i: (0, 0),
                                     pipeline_mode=pl.Buffered(1)))
        flat_args += [w, b]
    out_specs = pl.BlockSpec((tm, out_dim), lambda i: (i, 0))

    flops = sum(2 * padded * w.shape[0] * w.shape[1] for (w, _) in layer_params)
    bytes_accessed = padded * in_dim * x_item + padded * out_dim * out_item + resident
    needed = resident + tm * per_row
    vmem_limit = int(min(int(cap * 0.9),
                         max(needed + needed // 4, 32 * 1024 * 1024)))

    # Megacore sharding only pays off with a few steps per core; otherwise
    # keep a single core so both cores don't duplicate the resident weights.
    semantics = ("parallel",) if grid[0] >= 4 else ("arbitrary",)

    out = pl.pallas_call(
        make_fnn_kernel(num_layers, compute_dtype),
        out_shape=jax.ShapeDtypeStruct((padded, out_dim), out_dtype),
        grid_spec=pltpu.PrefetchScalarGridSpec(
            num_scalar_prefetch=0,
            grid=grid,
            in_specs=in_specs,
            out_specs=out_specs,
        ),
        compiler_params=pltpu.CompilerParams(
            dimension_semantics=semantics,
            vmem_limit_bytes=vmem_limit,
        ),
        cost_estimate=pl.CostEstimate(
            flops=flops, transcendentals=0, bytes_accessed=int(bytes_accessed)),
    )(*flat_args)

    if padded != batch:
        out = out[:batch]
    if out_features is not None and out_features != out_dim:
        out = out[:, :out_features]
    return out


def fnn_forward(x, kernel_params, *, out_features=None, block_m=512,
                training=False, dropout_p=0.2):
    """Forward pass of the FNN (eval mode). kernel_params from prepare_params."""
    if training and dropout_p > 0.0:
        # TODO(synk): training-mode dropout (pltpu.prng_seed/prng_random_bits
        #             mask) not implemented; RNG stream cannot match PyTorch's.
        raise NotImplementedError("FNN Pallas kernel implements eval-mode dropout only")
    groups = _split_for_capacity(kernel_params)
    h = x
    for gi, group in enumerate(groups):
        last = gi == len(groups) - 1
        h = _fused_forward(h, group, block_m=block_m,
                           out_features=out_features if last else None)
    return h


def init_params(key, in_features, hid_sizes):
    """Deterministic init matching nn.Linear shapes: W (out, in), b (out,)."""
    params = []
    dims = [in_features] + list(hid_sizes)
    for i in range(len(hid_sizes)):
        fan_in, fan_out = dims[i], dims[i + 1]
        key, kw, kb = jax.random.split(key, 3)
        bound = 1.0 / jnp.sqrt(jnp.float32(fan_in))
        w = jax.random.uniform(kw, (fan_out, fan_in), jnp.float32, -bound, bound)
        b = jax.random.uniform(kb, (fan_out,), jnp.float32, -bound, bound)
        params.append((w, b))
    return params


def fnn_reference(x, params):
    """Pure-JAX f32 reference of the PyTorch forward (eval mode)."""
    h = x
    for w, b in params:
        h = h @ w.T + b
        h = jnp.where(h >= 0, h, NEG_SLOPE * h)
    return h


if __name__ == "__main__":
    key = jax.random.PRNGKey(0)
    batch, in_features = 1024, 32
    hid_sizes = [128, 256, 192]   # 192 exercises the pad-to-128-lanes path

    key, kx = jax.random.split(key)
    x = jax.random.normal(kx, (batch, in_features), jnp.float32)
    params = init_params(key, in_features, hid_sizes)

    # One-time layout conversion (outside the per-call path): W -> (in,out)
    # bf16, b -> (1,out) f32, feature dims zero-padded to 128 lanes.
    kernel_params, out_features = prepare_params(params, compute_dtype=jnp.bfloat16)

    out = fnn_forward(x, kernel_params, out_features=out_features, block_m=256)
    out = jax.block_until_ready(out)

    ref = fnn_reference(x, params)
    assert out.shape == (batch, hid_sizes[-1])
    # bf16 MXU operands with f32 accumulation vs. an f32 reference: compare at
    # bf16-level tolerance (normalized max error).
    err = float(jnp.max(jnp.abs(out - ref)) / (jnp.max(jnp.abs(ref)) + 1e-6))
    assert err < 5e-2, f"mismatch vs reference (rel err {err})"

    print("KERNEL_OK")
</pallas_src>

<mosaic_0001>
module attributes {stable_mosaic.version = 11 : i64} {
  func.func @kernel(%arg0: i32, %arg1: memref<256x32xf32, #tpu.memory_space<vmem>>, %arg2: memref<32x128xbf16, #tpu.memory_space<vmem>>, %arg3: memref<1x128xf32, #tpu.memory_space<vmem>>, %arg4: memref<128x256xbf16, #tpu.memory_space<vmem>>, %arg5: memref<1x256xf32, #tpu.memory_space<vmem>>, %arg6: memref<256x256xbf16, #tpu.memory_space<vmem>>, %arg7: memref<1x256xf32, #tpu.memory_space<vmem>>, %arg8: memref<256x256xf32, #tpu.memory_space<vmem>>) attributes {dimension_semantics = [#tpu.dimension_semantics<parallel>], iteration_bounds = array<i64: 4>, scalar_prefetch = 0 : i64, scratch_operands = 0 : i64, tpu.core_type = #tpu.core_type<tc>, window_params = [{transform_indices = @transform_0, window_bounds = array<i64: 256, 32>}, {pipeline_mode = #tpu.pipeline_mode<synchronous>, transform_indices = @transform_1, window_bounds = array<i64: 32, 128>}, {pipeline_mode = #tpu.pipeline_mode<synchronous>, transform_indices = @transform_2, window_bounds = array<i64: 1, 128>}, {pipeline_mode = #tpu.pipeline_mode<synchronous>, transform_indices = @transform_3, window_bounds = array<i64: 128, 256>}, {pipeline_mode = #tpu.pipeline_mode<synchronous>, transform_indices = @transform_4, window_bounds = array<i64: 1, 256>}, {pipeline_mode = #tpu.pipeline_mode<synchronous>, transform_indices = @transform_5, window_bounds = array<i64: 256, 256>}, {pipeline_mode = #tpu.pipeline_mode<synchronous>, transform_indices = @transform_6, window_bounds = array<i64: 1, 256>}, {transform_indices = @transform_7, window_bounds = array<i64: 256, 256>}]} {
    %c0 = arith.constant 0 : index
    %c0_0 = arith.constant 0 : index
    %0 = vector.load %arg1[%c0, %c0_0] : memref<256x32xf32, #tpu.memory_space<vmem>>, vector<256x32xf32>
    %1 = arith.truncf %0 : vector<256x32xf32> to vector<256x32xbf16>
    %c0_1 = arith.constant 0 : index
    %c0_2 = arith.constant 0 : index
    %2 = vector.load %arg2[%c0_1, %c0_2] : memref<32x128xbf16, #tpu.memory_space<vmem>>, vector<32x128xbf16>
    %c0_3 = arith.constant 0 : index
    %c0_4 = arith.constant 0 : index
    %3 = vector.load %arg3[%c0_3, %c0_4] : memref<1x128xf32, #tpu.memory_space<vmem>>, vector<1x128xf32>
    %cst = arith.constant dense<0.000000e+00> : vector<256x128xf32>
    %4 = tpu.matmul %1, %2, %cst {dimension_numbers = #tpu.dot_dimension_numbers<[1], [0], [0], [1], [0, 0, 1, 1], [], []>} : vector<256x32xbf16>, vector<32x128xbf16>, vector<256x128xf32> -> vector<256x128xf32>
    %5 = vector.broadcast %3 : vector<1x128xf32> to vector<256x128xf32>
    %6 = arith.addf %4, %5 : vector<256x128xf32>
    %cst_5 = arith.constant 0.000000e+00 : f32
    %7 = vector.broadcast %cst_5 : f32 to vector<256x128xf32>
    %8 = arith.cmpf oge, %6, %7 : vector<256x128xf32>
    %cst_6 = arith.constant 0.00999999977 : f32
    %9 = vector.broadcast %cst_6 : f32 to vector<256x128xf32>
    %10 = arith.mulf %9, %6 : vector<256x128xf32>
    %11 = arith.select %8, %6, %10 : vector<256x128xi1>, vector<256x128xf32>
    %12 = arith.truncf %11 : vector<256x128xf32> to vector<256x128xbf16>
    %c0_7 = arith.constant 0 : index
    %c0_8 = arith.constant 0 : index
    %13 = vector.load %arg4[%c0_7, %c0_8] : memref<128x256xbf16, #tpu.memory_space<vmem>>, vector<128x256xbf16>
    %c0_9 = arith.constant 0 : index
    %c0_10 = arith.constant 0 : index
    %14 = vector.load %arg5[%c0_9, %c0_10] : memref<1x256xf32, #tpu.memory_space<vmem>>, vector<1x256xf32>
    %cst_11 = arith.constant dense<0.000000e+00> : vector<256x256xf32>
    %15 = tpu.matmul %12, %13, %cst_11 {dimension_numbers = #tpu.dot_dimension_numbers<[1], [0], [0], [1], [0, 0, 1, 1], [], []>} : vector<256x128xbf16>, vector<128x256xbf16>, vector<256x256xf32> -> vector<256x256xf32>
    %16 = vector.broadcast %14 : vector<1x256xf32> to vector<256x256xf32>
    %17 = arith.addf %15, %16 : vector<256x256xf32>
    %cst_12 = arith.constant 0.000000e+00 : f32
    %18 = vector.broadcast %cst_12 : f32 to vector<256x256xf32>
    %19 = arith.cmpf oge, %17, %18 : vector<256x256xf32>
    %cst_13 = arith.constant 0.00999999977 : f32
    %20 = vector.broadcast %cst_13 : f32 to vector<256x256xf32>
    %21 = arith.mulf %20, %17 : vector<256x256xf32>
    %22 = arith.select %19, %17, %21 : vector<256x256xi1>, vector<256x256xf32>
    %23 = arith.truncf %22 : vector<256x256xf32> to vector<256x256xbf16>
    %c0_14 = arith.constant 0 : index
    %c0_15 = arith.constant 0 : index
    %24 = vector.load %arg6[%c0_14, %c0_15] : memref<256x256xbf16, #tpu.memory_space<vmem>>, vector<256x256xbf16>
    %c0_16 = arith.constant 0 : index
    %c0_17 = arith.constant 0 : index
    %25 = vector.load %arg7[%c0_16, %c0_17] : memref<1x256xf32, #tpu.memory_space<vmem>>, vector<1x256xf32>
    %cst_18 = arith.constant dense<0.000000e+00> : vector<256x256xf32>
    %26 = tpu.matmul %23, %24, %cst_18 {dimension_numbers = #tpu.dot_dimension_numbers<[1], [0], [0], [1], [0, 0, 1, 1], [], []>} : vector<256x256xbf16>, vector<256x256xbf16>, vector<256x256xf32> -> vector<256x256xf32>
    %27 = vector.broadcast %25 : vector<1x256xf32> to vector<256x256xf32>
    %28 = arith.addf %26, %27 : vector<256x256xf32>
    %cst_19 = arith.constant 0.000000e+00 : f32
    %29 = vector.broadcast %cst_19 : f32 to vector<256x256xf32>
    %30 = arith.cmpf oge, %28, %29 : vector<256x256xf32>
    %cst_20 = arith.constant 0.00999999977 : f32
    %31 = vector.broadcast %cst_20 : f32 to vector<256x256xf32>
    %32 = arith.mulf %31, %28 : vector<256x256xf32>
    %33 = arith.select %30, %28, %32 : vector<256x256xi1>, vector<256x256xf32>
    %c0_21 = arith.constant 0 : index
    %c0_22 = arith.constant 0 : index
    %34 = vector.load %arg8[%c0_21, %c0_22] : memref<256x256xf32, #tpu.memory_space<vmem>>, vector<256x256xf32>
    tpu.vector_store %arg8[%c0_21, %c0_22], %33 {strides = array<i32>} : memref<256x256xf32, #tpu.memory_space<vmem>>, vector<256x256xf32>,
    return
  }
  func.func @transform_0(%arg0: i32) -> (i32, i32) {
    %c0_i32 = arith.constant 0 : i32
    %c0_i32_0 = arith.constant 0 : i32
    return %arg0, %c0_i32 : i32, i32
  }
  func.func @transform_1(%arg0: i32) -> (i32, i32) {
    %c0_i32 = arith.constant 0 : i32
    %c0_i32_0 = arith.constant 0 : i32
    %c0_i32_1 = arith.constant 0 : i32
    return %c0_i32, %c0_i32_0 : i32, i32
  }
  func.func @transform_2(%arg0: i32) -> (i32, i32) {
    %c0_i32 = arith.constant 0 : i32
    %c0_i32_0 = arith.constant 0 : i32
    %c0_i32_1 = arith.constant 0 : i32
    return %c0_i32, %c0_i32_0 : i32, i32
  }
  func.func @transform_3(%arg0: i32) -> (i32, i32) {
    %c0_i32 = arith.constant 0 : i32
    %c0_i32_0 = arith.constant 0 : i32
    %c0_i32_1 = arith.constant 0 : i32
    return %c0_i32, %c0_i32_0 : i32, i32
  }
  func.func @transform_4(%arg0: i32) -> (i32, i32) {
    %c0_i32 = arith.constant 0 : i32
    %c0_i32_0 = arith.constant 0 : i32
    %c0_i32_1 = arith.constant 0 : i32
    return %c0_i32, %c0_i32_0 : i32, i32
  }
  func.func @transform_5(%arg0: i32) -> (i32, i32) {
    %c0_i32 = arith.constant 0 : i32
    %c0_i32_0 = arith.constant 0 : i32
    %c0_i32_1 = arith.constant 0 : i32
    return %c0_i32, %c0_i32_0 : i32, i32
  }
  func.func @transform_6(%arg0: i32) -> (i32, i32) {
    %c0_i32 = arith.constant 0 : i32
    %c0_i32_0 = arith.constant 0 : i32
    %c0_i32_1 = arith.constant 0 : i32
    return %c0_i32, %c0_i32_0 : i32, i32
  }
  func.func @transform_7(%arg0: i32) -> (i32, i32) {
    %c0_i32 = arith.constant 0 : i32
    %c0_i32_0 = arith.constant 0 : i32
    return %arg0, %c0_i32 : i32, i32
  }
}

</mosaic_0001>

<bundles_post_ra>
// kernel: tpu_custom_call.1
= control target key start
LH: loop header
LB: loop body
LE: loop exit
PB: predicated region body
PF: predicated region fallthrough
CT: control target
= control target key end

     0   :  { %12 = vsyncpa [#allocation3], 0  ;;  %s3427_s0 = inlined_call_operand.vmem [shape: f32[1024,32], index: 0, kind: input, shape index: {}]   ;;  %s3428_s1 = inlined_call_operand.vmem [shape: bf16[32,128], index: 1, kind: input, shape index: {}]   ;;  %s3429_s2 = inlined_call_operand.vmem [shape: f32[1,128], index: 2, kind: input, shape index: {}]   ;;  %s3430_s3 = inlined_call_operand.vmem [shape: bf16[128,256], index: 3, kind: input, shape index: {}]   ;;  %s3431_s4 = inlined_call_operand.vmem [shape: f32[1,256], index: 4, kind: input, shape index: {}]   ;;  %s3432_s5 = inlined_call_operand.vmem [shape: bf16[256,256], index: 5, kind: input, shape index: {}]   ;;  %s3433_s6 = inlined_call_operand.vmem [shape: f32[1,256], index: 6, kind: input, shape index: {}]   ;;  %s3434_s7 = inlined_call_operand.hbm [shape: f32[1024,256], index: 7, kind: output, shape index: {}]  }
   0x1   :  { %14 = vsyncpa [#allocation3 + $0x1], 0  ;;  %s2439_s24 = smov 0   ;;  %s2441_s25 = smov 0  }
   0x2   :  { %s2443_s26 = smov 0   ;;  %s2445_s27 = smov 0  }
   0x3 LB: > { %s2460_s28 = sadd.s32 4294967295, %s2395_s27   ;;  %s1992_s29 = sadd.s32 4294967294, %s2395_s27   ;;  %s2395_s27 = sphi %s2445_s27, %s3440_s27   ;;  %s2391_s26 = sphi %s2443_s26, %s3439_s26   ;;  %s2387_s25 = sphi %s2441_s25, %s3438_s25   ;;  %s2383_s24 = sphi %s2439_s24, %s3437_s24  }
   0x4   : > { %s2464_s30 = sadd.s32 1, %s2395_s27   ;;  %s179_s8 = sadd.s32 1, %s2391_s26 }
   0x5   : > { %s176_s9 = ssub.s32 %s2395_s27, %s2464_s30  ;;  %p189_p0 = scmp.ne.s32.totalorder %s2391_s26, %s2387_s25 }
   0x6   : > { %p177_p1 = scmp.eq.s32.totalorder %s176_s9, 0  ;;  %p190_p2 = scmp.eq.s32.totalorder %s2460_s28, 3 }
   0x7   : > { %p195_p3 = scmp.ne.s32.totalorder %s2387_s25, %s2383_s24  ;;  %p196_p4 = scmp.eq.s32.totalorder %s1992_s29, 3 }
   0x8   : > { %s2475_s10 = scalar_select %p177_p1, %s2391_s26, %s179_s8  }
   0x9   : > { %p2477_p5 = por %p190_p2, %p189_p0  ;;  %p2481_p6 = por %p196_p4, %p195_p3 }
   0xa   : > { %p1995_p7 = scmp.ge.s32.totalorder %s2395_s27, 1  ;;  %p241_p8 = scmp.lt.s32.totalorder %s2395_s27, 5 }
   0xc   : > { %p242_p9 = pnand %p1995_p7, %p241_p8 }
   0xd   : > { %s1997_s15 = sshll.u32 (!%p242_p9), %s2460_s28, 5  ;;  %s270_s14 = sand.u32 (!%p242_p9), 1, %s2387_s25  }
   0xe   : > { %245 = sbr.rel (%p242_p9) target bundleno = 879 (0x36f), region = 48  ;;  %p274_p10 = scmp.lt.s32.totalorder (!%p242_p9), %s1997_s15, 127 }
   0xf   : > { %s2272_s17 = sshll.u32 (!%p242_p9), %s2460_s28, 9  ;;  %s1914_s28 = scalar_lea.sflag (!%p242_p9), [#allocation3], %s270_s14 }
  0x10   : > { %s1926_s20 = scalar_lea.hbm (!%p242_p9), %s3434_s7, %s2272_s17  ;;  %s2353_s13 = scalar_lea.hbm (!%p242_p9), %s3434_s7, 2048 }
  0x13   : > { %v2222_v0 = vld [vmem:[%s3428_s1 + $0x8] sm:$0xff]  ;;  %v2221_v1 = vld [vmem:[%s3428_s1] sm:$0xff]  ;;  %s3442_s15 = smov (!%p274_p10, %s1997_s15), 127  ;;  %vm349_vm0 = vcmask 261120   ;;  %v2081_v17 = vld [vmem:[%s3430_s3 + $0x70] sm:$0xf] }
  0x14   : > { %404 = vmatpush.bf16.msra.mxu0 %v2222_v0  ;;  %2273 = vmatpush.bf16.msra.mxu3 %v2222_v0  ;;  %s1998_s18 = sshll.u32 %s3442_s15, 3  ;;  %v2238_v18 = vld [vmem:[%s3430_s3 + $0x74] sm:$0xf0]  ;;  %v2237_v19 = vld [vmem:[%s3430_s3 + $0x74] sm:$0xf]  ;;  %s1996_s15 = sshll.u32 %s270_s14, 9 }
  0x15   : > { %s2497_s21 = scalar_lea.vmem %s3427_s0, %s1998_s18  ;;  %v2082_v20 = vor.u32 %v2238_v18, %v2081_v17  ;;  %v2083_v21 = vld [vmem:[%s3430_s3 + $0x78] sm:$0xf0]  ;;  %v2073_v26 = vld [vmem:[%s3430_s3 + $0x60] sm:$0xf]  ;;  %v2236_v27 = vld [vmem:[%s3430_s3 + $0x64] sm:$0xf0] }
  0x16   : > { %v281_v2 = vld [vmem:[%s2497_s21] sm:$0xff]  ;;  %v282_v3 = vld [vmem:[%s2497_s21 + $0x8] sm:$0xff]  ;;  %v283_v5 = vld [vmem:[%s2497_s21 + $0x10] sm:$0xff]  ;;  %v2526_v22 = vor.u32 %v2237_v19, %v2083_v21  ;;  %v2074_v29 = vor.u32 %v2236_v27, %v2073_v26  ;;  %s3131_s16 = scalar_lea.vmem [#allocation2], %s1996_s15 }
  0x17   : > { %v313_v4 = vpack.c.bf16 %v282_v3, %v281_v2  ;;  %v284_v6 = vld [vmem:[%s2497_s21 + $0x18] sm:$0xff]  ;;  %v285_v8 = vld [vmem:[%s2497_s21 + $0x20] sm:$0xff]  ;;  %v286_v9 = vld [vmem:[%s2497_s21 + $0x28] sm:$0xff]  ;;  %701 = vmatpush.bf16.msra.mxu1 %v2082_v20  ;;  %s1927_s22 = sshll.u32 %s3131_s16, 4  ;;  %s1928_s22 = int_to_ptr.vmem [resolvable:$true] %s1927_s22 }
  0x18   : > { %405 = vmatpush.bf16.msra.mxu0 %v2221_v1  ;;  %2274 = vmatpush.bf16.msra.mxu3 %v2221_v1  ;;  %v314_v7 = vpack.c.bf16 %v284_v6, %v283_v5  ;;  %v315_v10 = vpack.c.bf16 %v286_v9, %v285_v8  ;;  %v287_v11 = vld [vmem:[%s2497_s21 + $0x30] sm:$0xff]  ;;  %v288_v12 = vld [vmem:[%s2497_s21 + $0x38] sm:$0xff]  ;;  %v289_v14 = vld [vmem:[%s2497_s21 + $0x40] sm:$0xff] }
  0x19   : > { %v316_v13 = vpack.c.bf16 %v288_v12, %v287_v11  ;;  %v290_v15 = vld [vmem:[%s2497_s21 + $0x48] sm:$0xff]  ;;  %790 = vmatpush.bf16.msra.mxu2 %v2526_v22  ;;  %v291_v23 = vld [vmem:[%s2497_s21 + $0x50] sm:$0xff]  ;;  %v292_v24 = vld [vmem:[%s2497_s21 + $0x58] sm:$0xff] }
  0x1a   : > { %v317_v16 = vpack.c.bf16 %v290_v15, %v289_v14  ;;  %v318_v25 = vpack.c.bf16 %v292_v24, %v291_v23  ;;  %v2235_v28 = vld [vmem:[%s3430_s3 + $0x64] sm:$0xf]  ;;  %v2075_v30 = vld [vmem:[%s3430_s3 + $0x68] sm:$0xf0]  ;;  %v2065_v31 = vld [vmem:[%s3430_s3 + $0x50] sm:$0xf] }
  0x1b   : > { %2007 = vmatmul.msk.bf16.vlgmr.msra.gmra.mxu0 %vm349_vm0, %v313_v4  ;;  %v2234_v32 = vld [vmem:[%s3430_s3 + $0x54] sm:$0xf0]  ;;  %v2550_v33 = vor.u32 %v2235_v28, %v2075_v30  ;;  %v2233_v34 = vld [vmem:[%s3430_s3 + $0x54] sm:$0xf]  ;;  %v2067_v35 = vld [vmem:[%s3430_s3 + $0x58] sm:$0xf0]  ;;  %702 = vmatpush.bf16.msra.mxu1 %v2074_v29 }
  0x1c   : > { %2275 = vmatpush.bf16.msrb.mxu3 %v2082_v20  ;;  %v2066_v36 = vor.u32 %v2234_v32, %v2065_v31  ;;  %v2559_v37 = vor.u32 %v2233_v34, %v2067_v35  ;;  %v2057_v38 = vld [vmem:[%s3430_s3 + $0x40] sm:$0xf]  ;;  %v2232_v39 = vld [vmem:[%s3430_s3 + $0x44] sm:$0xf0]  ;;  %v2231_v40 = vld [vmem:[%s3430_s3 + $0x44] sm:$0xf] }
  0x1d   : > { %791 = vmatpush.bf16.msra.mxu2 %v2550_v33  ;;  %v2059_v41 = vld [vmem:[%s3430_s3 + $0x48] sm:$0xf0]  ;;  %v2058_v42 = vor.u32 %v2232_v39, %v2057_v38  ;;  %v293_v44 = vld [vmem:[%s2497_s21 + $0x60] sm:$0xff]  ;;  %v2049_v46 = vld [vmem:[%s3430_s3 + $0x30] sm:$0xf] }
  0x1e   : > { %v2574_v43 = vor.u32 %v2231_v40, %v2059_v41  ;;  %v294_v45 = vld [vmem:[%s2497_s21 + $0x68] sm:$0xff]  ;;  %v2230_v47 = vld [vmem:[%s3430_s3 + $0x34] sm:$0xf0]  ;;  %v2229_v48 = vld [vmem:[%s3430_s3 + $0x34] sm:$0xf] }
  0x1f   : > { %703 = vmatpush.bf16.msra.mxu1 %v2066_v36  ;;  %v319_v49 = vpack.c.bf16 %v294_v45, %v293_v44  ;;  %v2050_v50 = vor.u32 %v2230_v47, %v2049_v46  ;;  %v2051_v51 = vld [vmem:[%s3430_s3 + $0x38] sm:$0xf0]  ;;  %v2041_v53 = vld [vmem:[%s3430_s3 + $0x20] sm:$0xf]  ;;  %v2228_v54 = vld [vmem:[%s3430_s3 + $0x24] sm:$0xf0] }
  0x20   : > { %2276 = vmatpush.bf16.msrb.mxu3 %v2074_v29  ;;  %v2591_v52 = vor.u32 %v2229_v48, %v2051_v51  ;;  %v2227_v55 = vld [vmem:[%s3430_s3 + $0x24] sm:$0xf]  ;;  %v2042_v56 = vor.u32 %v2228_v54, %v2041_v53  ;;  %v2043_v57 = vld [vmem:[%s3430_s3 + $0x28] sm:$0xf0]  ;;  %v2033_v59 = vld [vmem:[%s3430_s3 + $0x10] sm:$0xf] }
  0x21   : > { %792 = vmatpush.bf16.msra.mxu2 %v2559_v37  ;;  %v2607_v58 = vor.u32 %v2227_v55, %v2043_v57  ;;  %v2226_v60 = vld [vmem:[%s3430_s3 + $0x14] sm:$0xf0]  ;;  %v2225_v61 = vld [vmem:[%s3430_s3 + $0x14] sm:$0xf]  ;;  %v2035_v63 = vld [vmem:[%s3430_s3 + $0x18] sm:$0xf0] }
  0x22   : > { %v2034_v62 = vor.u32 %v2226_v60, %v2033_v59  ;;  %v2622_v0 = vor.u32 %v2225_v61, %v2035_v63  ;;  %v2025_v1 = vld [vmem:[%s3430_s3] sm:$0xf]  ;;  %v2224_v2 = vld [vmem:[%s3430_s3 + $0x4] sm:$0xf0]  ;;  %v2223_v3 = vld [vmem:[%s3430_s3 + $0x4] sm:$0xf] }
  0x23   : > { %704 = vmatpush.bf16.msra.mxu1 %v2058_v42  ;;  %v2026_v4 = vor.u32 %v2224_v2, %v2025_v1  ;;  %v2027_v5 = vld [vmem:[%s3430_s3 + $0x8] sm:$0xf0]  ;;  %v295_v6 = vld [vmem:[%s2497_s21 + $0x70] sm:$0xff]  ;;  %v2648_v14 = vld [vmem:[%s3429_s2] ss:$0 sm:$0xff] }
  0x24   : > { %2277 = vmatpush.bf16.msrb.mxu3 %v2066_v36  ;;  %v2639_v8 = vor.u32 %v2223_v3, %v2027_v5  ;;  %v298_v11 = vld [vmem:[%s2497_s21 + $0x88] sm:$0xff]  ;;  %v299_v20 = vld [vmem:[%s2497_s21 + $0x90] sm:$0xff]  ;;  %v300_v21 = vld [vmem:[%s2497_s21 + $0x98] sm:$0xff] }
  0x25   : > { %793 = vmatpush.bf16.msra.mxu2 %v2574_v43  ;;  %v322_v26 = vpack.c.bf16 %v300_v21, %v299_v20  ;;  %v301_v34 = vld [vmem:[%s2497_s21 + $0xa0] sm:$0xff]  ;;  %v302_v35 = vld [vmem:[%s2497_s21 + $0xa8] sm:$0xff]  ;;  %v308_v44 = vld [vmem:[%s2497_s21 + $0xd8] sm:$0xff] }
  0x26   : > { %v323_v40 = vpack.c.bf16 %v302_v35, %v301_v34  ;;  %v303_v51 = vld [vmem:[%s2497_s21 + $0xb0] sm:$0xff]  ;;  %v304_v53 = vld [vmem:[%s2497_s21 + $0xb8] sm:$0xff]  ;;  %v309_v59 = vld [vmem:[%s2497_s21 + $0xe0] sm:$0xff] }
  0x27   : > { %705 = vmatpush.bf16.msra.mxu1 %v2050_v50  ;;  %v324_v57 = vpack.c.bf16 %v304_v53, %v303_v51  ;;  %v310_v60 = vld [vmem:[%s2497_s21 + $0xe8] sm:$0xff]  ;;  %v2177_v53 = vld [vmem:[%s3432_s5 + $0xb0] sm:$0xf] }
  0x28   : > { %2278 = vmatpush.bf16.msrb.mxu3 %v2058_v42  ;;  %v307_v42 = vld [vmem:[%s2497_s21 + $0xd0] sm:$0xff]  ;;  %v327_v61 = vpack.c.bf16 %v310_v60, %v309_v59  ;;  %v306_v2 = vld [vmem:[%s2497_s21 + $0xc8] sm:$0xff]  ;;  %v2169_v60 = vld [vmem:[%s3432_s5 + $0xa0] sm:$0xf] }
  0x29   : > { %794 = vmatpush.bf16.msra.mxu2 %v2591_v52  ;;  %v326_v45 = vpack.c.bf16 %v308_v44, %v307_v42  ;;  %v2268_v34 = vld [vmem:[%s3432_s5 + $0xe4] sm:$0xf0] }
  0x2b   : > { %2008 = vmatmul.msk.bf16.gmra.mxu0 %vm349_vm0, %v314_v7  ;;  %706 = vmatpush.bf16.msra.mxu1 %v2042_v56  ;;  %v296_v7 = vld [vmem:[%s2497_s21 + $0x78] sm:$0xff] }
  0x2c   : > { %2279 = vmatpush.bf16.msrb.mxu3 %v2050_v50  ;;  %v320_v9 = vpack.c.bf16 %v296_v7, %v295_v6  ;;  %v311_v7 = vld [vmem:[%s2497_s21 + $0xf0] sm:$0xff] }
  0x2d   : > { %795 = vmatpush.bf16.msra.mxu2 %v2607_v58  ;;  %2020 = vmatmul.msk.bf16.vlgmr.msra.gmra.mxu3 %vm349_vm0, %v326_v45 }
  0x2f   : > { %707 = vmatpush.bf16.msra.mxu1 %v2034_v62 }
  0x30   : > { %2280 = vmatpush.bf16.msrb.mxu3 %v2042_v56 }
  0x31   : > { %796 = vmatpush.bf16.msra.mxu2 %v2622_v0 }
  0x33   : > { %708 = vmatpush.bf16.msra.mxu1 %v2026_v4 }
  0x34   : > { %2281 = vmatpush.bf16.msrb.mxu3 %v2034_v62 }
  0x35   : > { %797 = vmatpush.bf16.msra.mxu2 %v2639_v8 }
  0x38   : > { %2282 = vmatpush.bf16.msrb.mxu3 %v2026_v4 }
  0x3b   : > { %2009 = vmatmul.msk.bf16.gmra.mxu0 %vm349_vm0, %v315_v10  ;;  %v297_v10 = vld [vmem:[%s2497_s21 + $0x80] sm:$0xff] }
  0x3c   : > { %v321_v12 = vpack.c.bf16 %v298_v11, %v297_v10  ;;  %2283 = vmatpush.bf16.msra.mxu3 %v2526_v22 }
  0x3d   : > { %2021 = vmatmul.msk.bf16.gmra.mxu3 %vm349_vm0, %v327_v61  ;;  %v2260_v61 = vld [vmem:[%s3432_s5 + $0xa4] sm:$0xf0] }
  0x40   : > { %2284 = vmatpush.bf16.msra.mxu3 %v2550_v33 }
  0x44   : > { %2285 = vmatpush.bf16.msra.mxu3 %v2559_v37 }
  0x48   : > { %2286 = vmatpush.bf16.msra.mxu3 %v2574_v43  ;;  %v305_v43 = vld [vmem:[%s2497_s21 + $0xc0] sm:$0xff] }
  0x49   : > { %v325_v6 = vpack.c.bf16 %v306_v2, %v305_v43  ;;  %v2258_v43 = vld [vmem:[%s3432_s5 + $0x94] sm:$0xf0] }
  0x4b   : > { %2010 = vmatmul.msk.bf16.gmra.mxu0 %vm349_vm0, %v316_v13 }
  0x4c   : > { %2287 = vmatpush.bf16.msra.mxu3 %v2591_v52 }
  0x50   : > { %2288 = vmatpush.bf16.msra.mxu3 %v2607_v58 }
  0x54   : > { %2289 = vmatpush.bf16.msra.mxu3 %v2622_v0 }
  0x58   : > { %2290 = vmatpush.bf16.msra.mxu3 %v2639_v8 }
  0x5b   : > { %2011 = vmatmul.msk.bf16.gmra.mxu0 %vm349_vm0, %v317_v16 }
  0x6b   : > { %2012 = vmatmul.msk.bf16.gmra.mxu0 %vm349_vm0, %v318_v25 }
  0x7b   : > { %2013 = vmatmul.msk.bf16.gmra.mxu0 %vm349_vm0, %v319_v49 }
  0x8b   : > { %2014 = vmatmul.msk.bf16.gmra.mxu0 %vm349_vm0, %v320_v9  ;;  %v312_v9 = vld [vmem:[%s2497_s21 + $0xf8] sm:$0xff]  ;;  %s1929_s21 = sshll.u32 %s1926_s20, 4  ;;  %s1930_s21 = int_to_ptr.hbm [resolvable:$true] %s1929_s21 }
  0x8c   : > { %v328_v10 = vpack.c.bf16 %v312_v9, %v311_v7  ;;  %v2153_v9 = vld [vmem:[%s3432_s5 + $0x80] sm:$0xf]  ;;  %s2347_s23 = sshra.s32 %s1930_s21, 4  ;;  %s2348_s23 = int_to_ptr.hbm [resolvable:$true] %s2347_s23 }
  0x8d   : > { %s2349_s29 = scalar_lea.hbm %s2348_s23, 512  ;;  %p2354_p0 = scmp.lt.s32.totalorder %s2348_s23, %s3434_s7 }
  0x8e   : > { %2022 = vmatmul.msk.bf16.gmra.mxu3 %vm349_vm0, %v328_v10  ;;  %v2256_v10 = vld [vmem:[%s3432_s5 + $0x84] sm:$0xf0]  ;;  %p2350_p11 = scmp.ne.s32.totalorder %s2348_s23, %s2349_s29  ;;  %p2355_p1 = scmp.lt.s32.totalorder %s2353_s13, %s2349_s29 }
  0x90   : > { %p2351_p12 = pnand %p2350_p11, %p2477_p5  ;;  %p2356_p2 = por %p2355_p1, %p2354_p0 }
  0x92   : > { %p2352_p13 = pneg %p2351_p12 }
  0x94   : > { %p2357_p3 = pnand %p2356_p2, %p2352_p13 }
  0x98   : > { %v407_v13 = vpop.f32.mrf.mxu0 }
  0x99   : > { %v408_v15 = vadd.f32 %v2648_v14, %v407_v13 }
  0x9b   : > { %2015 = vmatmul.msk.bf16.gmra.mxu0 %vm349_vm0, %v321_v12  ;;  %v519_v17 = vmul.f32 0.01, %v408_v15  ;;  %vm487_vm1 = vcmp.ge.f32.partialorder %v408_v15, 0.0 }
  0x9d   : > { %v551_v23 = vsel %vm487_vm1, %v408_v15, %v519_v17 }
  0xa0   : > { %v409_v16 = vpop.f32.mrf.mxu0 }
  0xa1   : > { %v410_v18 = vadd.f32 %v2648_v14, %v409_v16 }
  0xa3   : > { %v520_v19 = vmul.f32 0.01, %v410_v18  ;;  %vm488_vm2 = vcmp.ge.f32.partialorder %v410_v18, 0.0 }
  0xa5   : > { %v552_v24 = vsel %vm488_vm2, %v410_v18, %v520_v19 }
  0xa6   : > { %v583_v25 = vpack.c.bf16 %v552_v24, %v551_v23 }
  0xa8   : > { %v412_v27 = vpop.f32.mrf.mxu0  ;;  %709 = vmatmul.bf16.vlgmr.msra.gmra.mxu1 %v583_v25  ;;  %798 = vmatmul.bf16.vlgmr.msra.gmra.mxu2 %v583_v25 }
  0xa9   : > { %v413_v28 = vadd.f32 %v2648_v14, %v412_v27 }
  0xab   : > { %2016 = vmatmul.msk.bf16.gmra.mxu0 %vm349_vm0, %v322_v26  ;;  %v521_v30 = vmul.f32 0.01, %v413_v28  ;;  %vm489_vm3 = vcmp.ge.f32.partialorder %v413_v28, 0.0 }
  0xad   : > { %v553_v36 = vsel %vm489_vm3, %v413_v28, %v521_v30  ;;  %v2209_v28 = vld [vmem:[%s3432_s5 + $0xf0] sm:$0xf] }
  0xb0   : > { %v414_v29 = vpop.f32.mrf.mxu0 }
  0xb1   : > { %v415_v31 = vadd.f32 %v2648_v14, %v414_v29  ;;  %v2270_v29 = vld [vmem:[%s3432_s5 + $0xf4] sm:$0xf0] }
  0xb2   : > { %v2210_v30 = vor.u32 %v2270_v29, %v2209_v28  ;;  %v2775_v29 = vld [vmem:[%s3431_s4] sm:$0x3] }
  0xb3   : > { %v522_v32 = vmul.f32 0.01, %v415_v31  ;;  %vm490_vm4 = vcmp.ge.f32.partialorder %v415_v31, 0.0 }
  0xb4   : > { %1390 = vmatpush.bf16.msrb.mxu0 %v2210_v30 }
  0xb5   : > { %v554_v38 = vsel %vm490_vm4, %v415_v31, %v522_v32  ;;  %v2201_v32 = vld [vmem:[%s3432_s5 + $0xe0] sm:$0xf] }
  0xb6   : > { %v584_v39 = vpack.c.bf16 %v554_v38, %v553_v36  ;;  %v2202_v35 = vor.u32 %v2268_v34, %v2201_v32 }
  0xb8   : > { %v417_v41 = vpop.f32.mrf.mxu0  ;;  %714 = vmatmul.bf16.gmra.mxu1 %v584_v39  ;;  %803 = vmatmul.bf16.gmra.mxu2 %v584_v39 }
  0xb9   : > { %v418_v46 = vadd.f32 %v2648_v14, %v417_v41  ;;  %1391 = vmatpush.bf16.msrb.mxu0 %v2202_v35  ;;  %v2266_v41 = vld [vmem:[%s3432_s5 + $0xd4] sm:$0xf0]  ;;  %v2249_v35 = vld [vmem:[%s3432_s5 + $0x54] sm:$0xf] }
  0xbb   : > { %2017 = vmatmul.msk.bf16.gmra.mxu0 %vm349_vm0, %v323_v40  ;;  %v523_v48 = vmul.f32 0.01, %v418_v46  ;;  %vm491_vm5 = vcmp.ge.f32.partialorder %v418_v46, 0.0  ;;  %v2193_v40 = vld [vmem:[%s3432_s5 + $0xd0] sm:$0xf] }
  0xbc   : > { %v2194_v42 = vor.u32 %v2266_v41, %v2193_v40 }
  0xbd   : > { %v555_v54 = vsel %vm491_vm5, %v418_v46, %v523_v48  ;;  %v2264_v48 = vld [vmem:[%s3432_s5 + $0xc4] sm:$0xf0] }
  0xbe   : > { %1392 = vmatpush.bf16.msrb.mxu0 %v2194_v42 }
  0xc0   : > { %v419_v47 = vpop.f32.mrf.mxu0 }
  0xc1   : > { %v420_v49 = vadd.f32 %v2648_v14, %v419_v47  ;;  %v2185_v47 = vld [vmem:[%s3432_s5 + $0xc0] sm:$0xf] }
  0xc3   : > { %v524_v50 = vmul.f32 0.01, %v420_v49  ;;  %vm492_vm6 = vcmp.ge.f32.partialorder %v420_v49, 0.0 }
  0xc5   : > { %v556_v55 = vsel %vm492_vm6, %v420_v49, %v524_v50  ;;  %v2186_v50 = vor.u32 %v2264_v48, %v2185_v47  ;;  %v2247_v47 = vld [vmem:[%s3432_s5 + $0x44] sm:$0xf]  ;;  %v2123_v48 = vld [vmem:[%s3432_s5 + $0x48] sm:$0xf0] }
  0xc6   : > { %v585_v56 = vpack.c.bf16 %v556_v55, %v555_v54  ;;  %v2262_v54 = vld [vmem:[%s3432_s5 + $0xb4] sm:$0xf0] }
  0xc7   : > { %1393 = vmatpush.bf16.msrb.mxu0 %v2186_v50  ;;  %v2178_v55 = vor.u32 %v2262_v54, %v2177_v53  ;;  %v2126_v53 = vor.u32 %v2247_v47, %v2123_v48  ;;  %v2187_v54 = vld [vmem:[%s3432_s5 + $0xc8] sm:$0xf0] }
  0xc8   : > { %v422_v22 = vpop.f32.mrf.mxu0  ;;  %719 = vmatmul.bf16.gmra.mxu1 %v585_v56  ;;  %808 = vmatmul.bf16.gmra.mxu2 %v585_v56  ;;  %v2269_v56 = vld [vmem:[%s3432_s5 + $0xf4] sm:$0xf] }
  0xc9   : > { %v423_v33 = vadd.f32 %v2648_v14, %v422_v22 }
  0xcb   : > { %2018 = vmatmul.msk.bf16.gmra.mxu0 %vm349_vm0, %v324_v57  ;;  %v525_v62 = vmul.f32 0.01, %v423_v33  ;;  %vm493_vm7 = vcmp.ge.f32.partialorder %v423_v33, 0.0  ;;  %v2211_v57 = vld [vmem:[%s3432_s5 + $0xf8] sm:$0xf0] }
  0xcc   : > { %v2214_v59 = vor.u32 %v2269_v56, %v2211_v57  ;;  %1394 = vmatpush.bf16.msrb.mxu0 %v2178_v55 }
  0xcd   : > { %v557_v3 = vsel %vm493_vm7, %v423_v33, %v525_v62  ;;  %v2170_v33 = vor.u32 %v2260_v61, %v2169_v60 }
  0xce   : > { %1568 = vmatpush.bf16.msrb.mxu2 %v2214_v59 }
  0xd0   : > { %v424_v37 = vpop.f32.mrf.mxu0  ;;  %1395 = vmatpush.bf16.msrb.mxu0 %v2170_v33 }
  0xd1   : > { %v425_v63 = vadd.f32 %v2648_v14, %v424_v37 }
  0xd3   : > { %v526_v1 = vmul.f32 0.01, %v425_v63  ;;  %vm494_vm8 = vcmp.ge.f32.partialorder %v425_v63, 0.0 }
  0xd5   : > { %v558_v4 = vsel %vm494_vm8, %v425_v63, %v526_v1  ;;  %v2161_v1 = vld [vmem:[%s3432_s5 + $0x90] sm:$0xf] }
  0xd6   : > { %v586_v5 = vpack.c.bf16 %v558_v4, %v557_v3  ;;  %v2162_v2 = vor.u32 %v2258_v43, %v2161_v1  ;;  %v2253_v4 = vld [vmem:[%s3432_s5 + $0x74] sm:$0xf]  ;;  %v2179_v1 = vld [vmem:[%s3432_s5 + $0xb8] sm:$0xf0] }
  0xd8   : > { %v427_v52 = vpop.f32.mrf.mxu0  ;;  %724 = vmatmul.bf16.gmra.mxu1 %v586_v5  ;;  %813 = vmatmul.bf16.gmra.mxu2 %v586_v5  ;;  %v2147_v5 = vld [vmem:[%s3432_s5 + $0x78] sm:$0xf0] }
  0xd9   : > { %v428_v58 = vadd.f32 %v2648_v14, %v427_v52  ;;  %v2150_v7 = vor.u32 %v2253_v4, %v2147_v5  ;;  %1396 = vmatpush.bf16.msrb.mxu0 %v2162_v2 }
  0xdb   : > { %2019 = vmatmul.msk.bf16.gmra.mxu0 %vm349_vm0, %v325_v6  ;;  %v527_v12 = vmul.f32 0.01, %v428_v58  ;;  %vm495_vm9 = vcmp.ge.f32.partialorder %v428_v58, 0.0  ;;  %1479 = vmatpush.bf16.msrb.mxu1 %v2150_v7  ;;  %v2107_v7 = vld [vmem:[%s3432_s5 + $0x28] sm:$0xf0] }
  0xdd   : > { %v559_v15 = vsel %vm495_vm9, %v428_v58, %v527_v12 }
  0xe0   : > { %v429_v11 = vpop.f32.mrf.mxu0 }
  0xe1   : > { %v430_v0 = vadd.f32 %v2648_v14, %v429_v11  ;;  %v2154_v11 = vor.u32 %v2256_v10, %v2153_v9  ;;  %v2259_v9 = vld [vmem:[%s3432_s5 + $0xa4] sm:$0xf] }
  0xe3   : > { %v528_v13 = vmul.f32 0.01, %v430_v0  ;;  %vm496_vm10 = vcmp.ge.f32.partialorder %v430_v0, 0.0  ;;  %1397 = vmatpush.bf16.msrb.mxu0 %v2154_v11  ;;  %v2171_v11 = vld [vmem:[%s3432_s5 + $0xa8] sm:$0xf0] }
  0xe5   : > { %v560_v16 = vsel %vm496_vm10, %v430_v0, %v528_v13 }
  0xe6   : > { %v587_v17 = vpack.c.bf16 %v560_v16, %v559_v15 }
  0xe8   : > { %v432_v18 = vpop.f32.mrf.mxu0  ;;  %729 = vmatmul.bf16.gmra.mxu1 %v587_v17  ;;  %818 = vmatmul.bf16.gmra.mxu2 %v587_v17 }
  0xe9   : > { %v433_v8 = vadd.f32 %v2648_v14, %v432_v18  ;;  %v2267_v18 = vld [vmem:[%s3432_s5 + $0xe4] sm:$0xf] }
  0xeb   : > { %v529_v20 = vmul.f32 0.01, %v433_v8  ;;  %vm497_vm11 = vcmp.ge.f32.partialorder %v433_v8, 0.0 }
  0xed   : > { %v561_v24 = vsel %vm497_vm11, %v433_v8, %v529_v20  ;;  %v2203_v8 = vld [vmem:[%s3432_s5 + $0xe8] sm:$0xf0] }
  0xf0   : > { %v434_v19 = vpop.f32.mrf.mxu0 }
  0xf1   : > { %v435_v21 = vadd.f32 %v2648_v14, %v434_v19 }
  0xf3   : > { %v530_v23 = vmul.f32 0.01, %v435_v21  ;;  %vm498_vm12 = vcmp.ge.f32.partialorder %v435_v21, 0.0 }
  0xf5   : > { %v562_v25 = vsel %vm498_vm12, %v435_v21, %v530_v23  ;;  %v2206_v23 = vor.u32 %v2267_v18, %v2203_v8  ;;  %v2163_v18 = vld [vmem:[%s3432_s5 + $0x98] sm:$0xf0] }
  0xf6   : > { %v588_v26 = vpack.c.bf16 %v562_v25, %v561_v24 }
  0xf7   : > { %1569 = vmatpush.bf16.msrb.mxu2 %v2206_v23 }
  0xf8   : > { %v437_v27 = vpop.f32.mrf.mxu0  ;;  %734 = vmatmul.bf16.gmra.mxu1 %v588_v26  ;;  %823 = vmatmul.bf16.gmra.mxu2 %v588_v26  ;;  %v2251_v26 = vld [vmem:[%s3432_s5 + $0x64] sm:$0xf] }
  0xf9   : > { %v438_v31 = vadd.f32 %v2648_v14, %v437_v27  ;;  %v2139_v27 = vld [vmem:[%s3432_s5 + $0x68] sm:$0xf0] }
  0xfa   : > { %v2142_v28 = vor.u32 %v2251_v26, %v2139_v27  ;;  %v2239_v26 = vld [vmem:[%s3432_s5 + $0x4] sm:$0xf]  ;;  %v2091_v27 = vld [vmem:[%s3432_s5 + $0x8] sm:$0xf0] }
  0xfb   : > { %v531_v38 = vmul.f32 0.01, %v438_v31  ;;  %vm499_vm13 = vcmp.ge.f32.partialorder %v438_v31, 0.0 }
  0xfc   : > { %1480 = vmatpush.bf16.msrb.mxu1 %v2142_v28 }
  0xfd   : > { %v563_v45 = vsel %vm499_vm13, %v438_v31, %v531_v38  ;;  %v2778_v31 = vperm.slane %v2775_v29, 1  ;;  %v2265_v38 = vld [vmem:[%s3432_s5 + $0xd4] sm:$0xf] }
 0x100   : > { %v439_v36 = vpop.f32.mrf.mxu0 }
 0x101   : > { %v440_v39 = vadd.f32 %v2648_v14, %v439_v36  ;;  %v2131_v36 = vld [vmem:[%s3432_s5 + $0x58] sm:$0xf0] }
 0x102   : > { %v2134_v42 = vor.u32 %v2249_v35, %v2131_v36  ;;  %v2255_v35 = vld [vmem:[%s3432_s5 + $0x84] sm:$0xf] }
 0x103   : > { %v532_v44 = vmul.f32 0.01, %v440_v39  ;;  %vm500_vm14 = vcmp.ge.f32.partialorder %v440_v39, 0.0 }
 0x104   : > { %1481 = vmatpush.bf16.msrb.mxu1 %v2134_v42 }
 0x105   : > { %v564_v46 = vsel %vm500_vm14, %v440_v39, %v532_v44  ;;  %v2195_v39 = vld [vmem:[%s3432_s5 + $0xd8] sm:$0xf0] }
 0x106   : > { %v589_v49 = vpack.c.bf16 %v564_v46, %v563_v45  ;;  %v2198_v46 = vor.u32 %v2265_v38, %v2195_v39  ;;  %v2155_v39 = vld [vmem:[%s3432_s5 + $0x88] sm:$0xf0] }
 0x108   : > { %v442_v51 = vpop.f32.mrf.mxu0  ;;  %739 = vmatmul.bf16.gmra.mxu1 %v589_v49  ;;  %828 = vmatmul.bf16.gmra.mxu2 %v589_v49  ;;  %v2263_v49 = vld [vmem:[%s3432_s5 + $0xc4] sm:$0xf] }
 0x109   : > { %v443_v22 = vadd.f32 %v2648_v14, %v442_v51  ;;  %1570 = vmatpush.bf16.msrb.mxu2 %v2198_v46  ;;  %v2190_v57 = vor.u32 %v2263_v49, %v2187_v54  ;;  %1482 = vmatpush.bf16.msrb.mxu1 %v2126_v53 }
 0x10b   : > { %v533_v62 = vmul.f32 0.01, %v443_v22  ;;  %vm501_vm15 = vcmp.ge.f32.partialorder %v443_v22, 0.0 }
 0x10d   : > { %v565_v6 = vsel %vm501_vm15, %v443_v22, %v533_v62  ;;  %1571 = vmatpush.bf16.msrb.mxu2 %v2190_v57  ;;  %v2115_v62 = vld [vmem:[%s3432_s5 + $0x38] sm:$0xf0] }
 0x110   : > { %v444_v37 = vpop.f32.mrf.mxu0 }
 0x111   : > { %v445_v63 = vadd.f32 %v2648_v14, %v444_v37  ;;  %v2245_v37 = vld [vmem:[%s3432_s5 + $0x34] sm:$0xf] }
 0x112   : > { %v2118_v4 = vor.u32 %v2245_v37, %v2115_v62 }
 0x113   : > { %v534_v3 = vmul.f32 0.01, %v445_v63  ;;  %vm502_vm0 = vcmp.ge.f32.partialorder %v445_v63, 0.0 }
 0x114   : > { %1483 = vmatpush.bf16.msrb.mxu1 %v2118_v4 }
 0x115   : > { %v566_v52 = vsel %vm502_vm0, %v445_v63, %v534_v3  ;;  %v2261_v63 = vld [vmem:[%s3432_s5 + $0xb4] sm:$0xf] }
 0x116   : > { %v590_v58 = vpack.c.bf16 %v566_v52, %v565_v6  ;;  %v2182_v6 = vor.u32 %v2261_v63, %v2179_v1  ;;  %v2243_v52 = vld [vmem:[%s3432_s5 + $0x24] sm:$0xf] }
 0x118   : > { %v447_v12 = vpop.f32.mrf.mxu0  ;;  %744 = vmatmul.bf16.gmra.mxu1 %v590_v58  ;;  %833 = vmatmul.bf16.gmra.mxu2 %v590_v58  ;;  %v2110_v58 = vor.u32 %v2243_v52, %v2107_v7  ;;  %v2884_v7 = vperm.slane %v2775_v29, 0 }
 0x119   : > { %v448_v0 = vadd.f32 %v2648_v14, %v447_v12  ;;  %1572 = vmatpush.bf16.msrb.mxu2 %v2182_v6  ;;  %v2174_v12 = vor.u32 %v2259_v9, %v2171_v11 }
 0x11a   : > { %1484 = vmatpush.bf16.msrb.mxu1 %v2110_v58 }
 0x11b   : > { %v535_v15 = vmul.f32 0.01, %v448_v0  ;;  %vm503_vm1 = vcmp.ge.f32.partialorder %v448_v0, 0.0 }
 0x11d   : > { %v567_v20 = vsel %vm503_vm1, %v448_v0, %v535_v15  ;;  %v2241_v15 = vld [vmem:[%s3432_s5 + $0x14] sm:$0xf]  ;;  %1573 = vmatpush.bf16.msrb.mxu2 %v2174_v12 }
 0x120   : > { %v449_v13 = vpop.f32.mrf.mxu0 }
 0x121   : > { %v450_v16 = vadd.f32 %v2648_v14, %v449_v13 }
 0x123   : > { %v536_v17 = vmul.f32 0.01, %v450_v16  ;;  %vm504_vm2 = vcmp.ge.f32.partialorder %v450_v16, 0.0 }
 0x125   : > { %v2764_v19 = vpop.f32.mrf.mxu1  ;;  %v568_v21 = vsel %vm504_vm2, %v450_v16, %v536_v17  ;;  %v2099_v16 = vld [vmem:[%s3432_s5 + $0x18] sm:$0xf0]  ;;  %v2257_v17 = vld [vmem:[%s3432_s5 + $0x94] sm:$0xf] }
 0x126   : > { %v591_v24 = vpack.c.bf16 %v568_v21, %v567_v20  ;;  %v711_v11 = vadd.f32 %v2764_v19, %v2884_v7 }
 0x128   : > { %v452_v25 = vpop.f32.mrf.mxu0  ;;  %749 = vmatmul.bf16.gmra.mxu1 %v591_v24  ;;  %838 = vmatmul.bf16.gmra.mxu2 %v591_v24  ;;  %v2102_v24 = vor.u32 %v2241_v15, %v2099_v16  ;;  %vm879_vm0 = vcmp.ge.f32.partialorder %v711_v11, 0.0 }
 0x129   : > { %v453_v32 = vadd.f32 %v2648_v14, %v452_v25  ;;  %v2166_v25 = vor.u32 %v2257_v17, %v2163_v18  ;;  %v943_v18 = vmul.f32 0.01, %v711_v11 }
 0x12a   : > { %1485 = vmatpush.bf16.msrb.mxu1 %v2102_v24 }
 0x12b   : > { %v799_v30 = vpop.f32.mrf.mxu2  ;;  %v537_v44 = vmul.f32 0.01, %v453_v32  ;;  %vm505_vm3 = vcmp.ge.f32.partialorder %v453_v32, 0.0  ;;  %1574 = vmatpush.bf16.msrb.mxu2 %v2166_v25  ;;  %v1007_v25 = vsel %vm879_vm0, %v711_v11, %v943_v18 }
 0x12c   : > { %v800_v40 = vadd.f32 %v799_v30, %v2778_v31 }
 0x12d   : > { %v2781_v34 = vpop.f32.mrf.mxu1  ;;  %v569_v59 = vsel %vm505_vm3, %v453_v32, %v537_v44  ;;  %v2094_v32 = vor.u32 %v2239_v26, %v2091_v27  ;;  %v2158_v44 = vor.u32 %v2255_v35, %v2155_v39 }
 0x12e   : > { %v944_v55 = vmul.f32 0.01, %v800_v40  ;;  %vm880_vm5 = vcmp.ge.f32.partialorder %v800_v40, 0.0 }
 0x12f   : > { %1486 = vmatpush.bf16.msrb.mxu1 %v2094_v32  ;;  %1575 = vmatpush.bf16.msrb.mxu2 %v2158_v44 }
 0x130   : > { %v454_v41 = vpop.f32.mrf.mxu0  ;;  %v1008_v43 = vsel %vm880_vm5, %v800_v40, %v944_v55 }
 0x131   : > { %v455_v45 = vadd.f32 %v2648_v14, %v454_v41 }
 0x133   : > { %v538_v50 = vmul.f32 0.01, %v455_v45  ;;  %v801_v51 = vpop.f32.mrf.mxu2  ;;  %vm506_vm4 = vcmp.ge.f32.partialorder %v455_v45, 0.0 }
 0x134   : > { %v802_v56 = vadd.f32 %v801_v51, %v2778_v31 }
 0x135   : > { %v2810_v22 = vpop.f32.mrf.mxu1  ;;  %v570_v60 = vsel %vm506_vm4, %v455_v45, %v538_v50 }
 0x136   : > { %vm882_vm6 = vcmp.ge.f32.partialorder %v802_v56, 0.0  ;;  %v946_v61 = vmul.f32 0.01, %v802_v56  ;;  %v592_v33 = vpack.c.bf16 %v570_v60, %v569_v59 }
 0x138   : > { %v1010_v2 = vsel %vm882_vm6, %v802_v56, %v946_v61  ;;  %v457_v3 = vpop.f32.mrf.mxu0  ;;  %754 = vmatmul.bf16.gmra.mxu1 %v592_v33  ;;  %843 = vmatmul.bf16.gmra.mxu2 %v592_v33 }
 0x139   : > { %v2825_v5 = vpack.c.bf16 %v1010_v2, %v1008_v43  ;;  %v458_v0 = vadd.f32 %v2648_v14, %v457_v3  ;;  %v472_v3 = vpop.f32.mrf.mxu3 }
 0x13a   : > { %v473_v44 = vadd.f32 %v2648_v14, %v472_v3 }
 0x13b   : > { %v804_v10 = vpop.f32.mrf.mxu2  ;;  %1398 = vmatmul.bf16.vlgmr.msrb.gmra.mxu0 %v2825_v5  ;;  %v539_v21 = vmul.f32 0.01, %v458_v0  ;;  %vm507_vm7 = vcmp.ge.f32.partialorder %v458_v0, 0.0 }
 0x13c   : > { %v805_v8 = vadd.f32 %v804_v10, %v2778_v31  ;;  %v713_v10 = vadd.f32 %v2781_v34, %v2884_v7  ;;  %vm513_vm6 = vcmp.ge.f32.partialorder %v473_v44, 0.0 }
 0x13d   : > { %v2841_v13 = vpop.f32.mrf.mxu1  ;;  %v571_v41 = vsel %vm507_vm7, %v458_v0, %v539_v21 }
 0x13e   : > { %v948_v36 = vmul.f32 0.01, %v805_v8  ;;  %vm884_vm9 = vcmp.ge.f32.partialorder %v805_v8, 0.0  ;;  %v945_v15 = vmul.f32 0.01, %v713_v10  ;;  %vm881_vm15 = vcmp.ge.f32.partialorder %v713_v10, 0.0 }
 0x140   : > { %v459_v20 = vpop.f32.mrf.mxu0  ;;  %v1012_v48 = vsel %vm884_vm9, %v805_v8, %v948_v36 }
 0x141   : > { %v460_v23 = vadd.f32 %v2648_v14, %v459_v20  ;;  %v474_v17 = vpop.f32.mrf.mxu3  ;;  %v1009_v20 = vsel %vm881_vm15, %v713_v10, %v945_v15 }
 0x143   : > { %v540_v28 = vmul.f32 0.01, %v460_v23  ;;  %v806_v30 = vpop.f32.mrf.mxu2  ;;  %vm508_vm8 = vcmp.ge.f32.partialorder %v460_v23, 0.0 }
 0x144   : > { %v807_v38 = vadd.f32 %v806_v30, %v2778_v31  ;;  %v2901_v30 = vpack.c.bf16 %v1009_v20, %v1007_v25 }
 0x145   : > { %v2870_v40 = vpop.f32.mrf.mxu1  ;;  %v572_v42 = vsel %vm508_vm8, %v460_v23, %v540_v28 }
 0x146   : > { %vm886_vm10 = vcmp.ge.f32.partialorder %v807_v38, 0.0  ;;  %v950_v45 = vmul.f32 0.01, %v807_v38  ;;  %v593_v46 = vpack.c.bf16 %v572_v42, %v571_v41  ;;  %v718_v42 = vadd.f32 %v2841_v13, %v2884_v7 }
 0x147   : > { %v721_v11 = vadd.f32 %v2870_v40, %v2884_v7 }
 0x148   : > { %v462_v47 = vpop.f32.mrf.mxu0  ;;  %759 = vmatmul.bf16.gmra.mxu1 %v593_v46  ;;  %848 = vmatmul.bf16.gmra.mxu2 %v593_v46  ;;  %v1014_v49 = vsel %vm886_vm10, %v807_v38, %v950_v45  ;;  %v475_v45 = vadd.f32 %v2648_v14, %v474_v17  ;;  %vm885_vm5 = vcmp.ge.f32.partialorder %v718_v42, 0.0 }
 0x149   : > { %v2872_v50 = vpack.c.bf16 %v1014_v49, %v1012_v48  ;;  %v463_v53 = vadd.f32 %v2648_v14, %v462_v47  ;;  %v477_v41 = vpop.f32.mrf.mxu3  ;;  %v716_v47 = vadd.f32 %v2810_v22, %v2884_v7  ;;  %v949_v49 = vmul.f32 0.01, %v718_v42 }
 0x14a   : > { %vm514_vm7 = vcmp.ge.f32.partialorder %v475_v45, 0.0 }
 0x14b   : > { %v809_v51 = vpop.f32.mrf.mxu2  ;;  %1403 = vmatmul.bf16.gmra.mxu0 %v2872_v50  ;;  %v541_v57 = vmul.f32 0.01, %v463_v53  ;;  %vm509_vm11 = vcmp.ge.f32.partialorder %v463_v53, 0.0  ;;  %v947_v13 = vmul.f32 0.01, %v716_v47  ;;  %vm883_vm8 = vcmp.ge.f32.partialorder %v716_v47, 0.0 }
 0x14c   : > { %v810_v55 = vadd.f32 %v809_v51, %v2778_v31  ;;  %v546_v51 = vmul.f32 0.01, %v475_v45 }
 0x14d   : > { %v2876_v54 = vpop.f32.mrf.mxu1  ;;  %v573_v63 = vsel %vm509_vm11, %v463_v53, %v541_v57 }
 0x14e   : > { %v952_v33 = vmul.f32 0.01, %v810_v55  ;;  %vm888_vm13 = vcmp.ge.f32.partialorder %v810_v55, 0.0  ;;  %v578_v57 = vsel %vm514_vm7, %v475_v45, %v546_v51 }
 0x150   : > { %v464_v56 = vpop.f32.mrf.mxu0  ;;  %v1016_v6 = vsel %vm888_vm13, %v810_v55, %v952_v33 }
 0x151   : > { %v465_v59 = vadd.f32 %v2648_v14, %v464_v56  ;;  %v479_v22 = vpop.f32.mrf.mxu3 }
 0x152   : > { %v480_v10 = vadd.f32 %v2648_v14, %v479_v22 }
 0x153   : > { %v542_v60 = vmul.f32 0.01, %v465_v59  ;;  %v811_v61 = vpop.f32.mrf.mxu2  ;;  %vm510_vm12 = vcmp.ge.f32.partialorder %v465_v59, 0.0 }
 0x154   : > { %v812_v37 = vadd.f32 %v811_v61, %v2778_v31  ;;  %vm516_vm13 = vcmp.ge.f32.partialorder %v480_v10, 0.0 }
 0x155   : > { %v2881_v62 = vpop.f32.mrf.mxu1  ;;  %v574_v1 = vsel %vm510_vm12, %v465_v59, %v542_v60  ;;  %v1013_v59 = vsel %vm885_vm5, %v718_v42, %v949_v49  ;;  %v2254_v42 = vld [vmem:[%s3432_s5 + $0x74] sm:$0xf0] }
 0x156   : > { %vm890_vm14 = vcmp.ge.f32.partialorder %v812_v37, 0.0  ;;  %v954_v43 = vmul.f32 0.01, %v812_v37  ;;  %v594_v2 = vpack.c.bf16 %v574_v1, %v573_v63 }
 0x158   : > { %v467_v4 = vpop.f32.mrf.mxu0  ;;  %764 = vmatmul.bf16.gmra.mxu1 %v594_v2  ;;  %853 = vmatmul.bf16.gmra.mxu2 %v594_v2  ;;  %v1018_v52 = vsel %vm890_vm14, %v812_v37, %v954_v43  ;;  %v1011_v37 = vsel %vm883_vm8, %v716_v47, %v947_v13  ;;  %vm887_vm14 = vcmp.ge.f32.partialorder %v721_v11, 0.0 }
 0x159   : > { %v2886_v9 = vpack.c.bf16 %v1018_v52, %v1016_v6  ;;  %v468_v12 = vadd.f32 %v2648_v14, %v467_v4  ;;  %v2925_v43 = vpack.c.bf16 %v1013_v59, %v1011_v37  ;;  %v723_v6 = vadd.f32 %v2876_v54, %v2884_v7  ;;  %v482_v15 = vpop.f32.mrf.mxu3 }
 0x15a   : > { %v478_v52 = vadd.f32 %v2648_v14, %v477_v41  ;;  %v951_v54 = vmul.f32 0.01, %v721_v11 }
 0x15b   : > { %v814_v58 = vpop.f32.mrf.mxu2  ;;  %1408 = vmatmul.bf16.gmra.mxu0 %v2886_v9  ;;  %v543_v8 = vmul.f32 0.01, %v468_v12  ;;  %vm511_vm1 = vcmp.ge.f32.partialorder %v468_v12, 0.0  ;;  %vm889_vm11 = vcmp.ge.f32.partialorder %v723_v6, 0.0 }
 0x15c   : > { %v815_v29 = vadd.f32 %v814_v58, %v2778_v31  ;;  %vm515_vm12 = vcmp.ge.f32.partialorder %v478_v52, 0.0 }
 0x15d   : > { %v2894_v0 = vpop.f32.mrf.mxu1  ;;  %v575_v27 = vsel %vm511_vm1, %v468_v12, %v543_v8 }
 0x15e   : > { %v956_v23 = vmul.f32 0.01, %v815_v29  ;;  %vm892_vm3 = vcmp.ge.f32.partialorder %v815_v29, 0.0  ;;  %v728_v45 = vadd.f32 %v2894_v0, %v2884_v7 }
 0x160   : > { %v469_v16 = vpop.f32.mrf.mxu0  ;;  %v1020_v36 = vsel %vm892_vm3, %v815_v29, %v956_v23  ;;  %v953_v29 = vmul.f32 0.01, %v723_v6  ;;  %v1015_v23 = vsel %vm887_vm14, %v721_v11, %v951_v54  ;;  %v957_v51 = vmul.f32 0.01, %v728_v45  ;;  %v2129_v11 = vld [vmem:[%s3432_s5 + $0x50] sm:$0xf] }
 0x161   : > { %v470_v34 = vadd.f32 %v2648_v14, %v469_v16  ;;  %v548_v16 = vmul.f32 0.01, %v480_v10  ;;  %vm893_vm1 = vcmp.ge.f32.partialorder %v728_v45, 0.0 }
 0x162   : > { %v1017_v20 = vsel %vm889_vm11, %v723_v6, %v953_v29  ;;  %v2250_v29 = vld [vmem:[%s3432_s5 + $0x54] sm:$0xf0] }
 0x163   : > { %vm512_vm2 = vcmp.ge.f32.partialorder %v470_v34, 0.0  ;;  %v544_v21 = vmul.f32 0.01, %v470_v34  ;;  %v816_v19 = vpop.f32.mrf.mxu2 }
 0x164   : > { %v817_v24 = vadd.f32 %v816_v19, %v2778_v31 }
 0x165   : > { %v2899_v26 = vpop.f32.mrf.mxu1  ;;  %v576_v28 = vsel %vm512_vm2, %v470_v34, %v544_v21  ;;  %v580_v34 = vsel %vm516_vm13, %v480_v10, %v548_v16 }
 0x166   : > { %vm894_vm4 = vcmp.ge.f32.partialorder %v817_v24, 0.0  ;;  %v958_v32 = vmul.f32 0.01, %v817_v24  ;;  %v2903_v35 = vpack.c.bf16 %v576_v28, %v575_v27  ;;  %v2947_v27 = vpack.c.bf16 %v1017_v20, %v1015_v23  ;;  %v484_v28 = vpop.f32.mrf.mxu3 }
 0x167   : > { %v485_v47 = vadd.f32 %v2648_v14, %v484_v28  ;;  %v731_v54 = vadd.f32 %v2899_v26, %v2884_v7 }
 0x168   : > { %769 = vmatmul.bf16.vlgmr.msrb.gmra.mxu3 %v2903_v35  ;;  %1487 = vmatmul.bf16.vlgmr.msrb.gmra.mxu1 %v2901_v30  ;;  %v1022_v38 = vsel %vm894_vm4, %v817_v24, %v958_v32 }
 0x169   : > { %1576 = vmatmul.bf16.vlgmr.msrb.gmra.mxu2 %v2825_v5  ;;  %v2908_v39 = vpack.c.bf16 %v1022_v38, %v1020_v36  ;;  %v545_v5 = vmul.f32 0.01, %v473_v44  ;;  %v2145_v38 = vld [vmem:[%s3432_s5 + $0x70] sm:$0xf]  ;;  %v550_v13 = vmul.f32 0.01, %v485_v47 }
 0x16a   : > { %vm518_vm3 = vcmp.ge.f32.partialorder %v485_v47, 0.0  ;;  %v959_v20 = vmul.f32 0.01, %v731_v54  ;;  %vm895_vm8 = vcmp.ge.f32.partialorder %v731_v54, 0.0 }
 0x16b   : > { %v819_v46 = vpop.f32.mrf.mxu2  ;;  %1413 = vmatmul.bf16.gmra.mxu0 %v2908_v39  ;;  %v577_v56 = vsel %vm513_vm6, %v473_v44, %v545_v5  ;;  %v2146_v44 = vor.u32 %v2254_v42, %v2145_v38 }
 0x16c   : > { %v820_v53 = vadd.f32 %v819_v46, %v2778_v31  ;;  %v2923_v1 = vpack.c.bf16 %v578_v57, %v577_v56  ;;  %v483_v46 = vadd.f32 %v2648_v14, %v482_v15  ;;  %v2137_v14 = vld [vmem:[%s3432_s5 + $0x60] sm:$0xf]  ;;  %v2252_v56 = vld [vmem:[%s3432_s5 + $0x64] sm:$0xf0] }
 0x16d   : > { %v2917_v48 = vpop.f32.mrf.mxu1  ;;  %1301 = vmatpush.bf16.msrb.mxu3 %v2146_v44 }
 0x16e   : > { %v960_v60 = vmul.f32 0.01, %v820_v53  ;;  %vm896_vm9 = vcmp.ge.f32.partialorder %v820_v53, 0.0  ;;  %vm517_vm2 = vcmp.ge.f32.partialorder %v483_v46, 0.0  ;;  %v733_v16 = vadd.f32 %v2917_v48, %v2884_v7  ;;  %v2248_v48 = vld [vmem:[%s3432_s5 + $0x44] sm:$0xf0] }
 0x170   : > { %v1024_v2 = vsel %vm896_vm9, %v820_v53, %v960_v60  ;;  %v549_v53 = vmul.f32 0.01, %v483_v46  ;;  %v582_v60 = vsel %vm518_vm3, %v485_v47, %v550_v13  ;;  %vm897_vm7 = vcmp.ge.f32.partialorder %v733_v16, 0.0  ;;  %v2246_v47 = vld [vmem:[%s3432_s5 + $0x34] sm:$0xf0] }
 0x172   : > { %v581_v59 = vsel %vm517_vm2, %v483_v46, %v549_v53 }
 0x173   : > { %v821_v55 = vpop.f32.mrf.mxu2  ;;  %v2979_v6 = vpack.c.bf16 %v582_v60, %v581_v59 }
 0x174   : > { %v822_v61 = vadd.f32 %v821_v55, %v2778_v31 }
 0x175   : > { %v2921_v33 = vpop.f32.mrf.mxu1 }
 0x176   : > { %vm898_vm10 = vcmp.ge.f32.partialorder %v822_v61, 0.0  ;;  %v962_v63 = vmul.f32 0.01, %v822_v61 }
 0x178   : > { %774 = vmatmul.bf16.gmra.mxu3 %v2923_v1  ;;  %1492 = vmatmul.bf16.gmra.mxu1 %v2925_v43  ;;  %v1026_v3 = vsel %vm898_vm10, %v822_v61, %v962_v63  ;;  %v1021_v61 = vsel %vm893_vm1, %v728_v45, %v957_v51  ;;  %v2113_v45 = vld [vmem:[%s3432_s5 + $0x30] sm:$0xf]  ;;  %v736_v51 = vadd.f32 %v2921_v33, %v2884_v7 }
 0x179   : > { %1581 = vmatmul.bf16.gmra.mxu2 %v2872_v50  ;;  %v2930_v4 = vpack.c.bf16 %v1026_v3, %v1024_v2  ;;  %v547_v50 = vmul.f32 0.01, %v478_v52 }
 0x17b   : > { %v824_v58 = vpop.f32.mrf.mxu2  ;;  %1418 = vmatmul.bf16.gmra.mxu0 %v2930_v4  ;;  %v579_v8 = vsel %vm515_vm12, %v478_v52, %v547_v50  ;;  %v2130_v50 = vor.u32 %v2250_v29, %v2129_v11  ;;  %vm899_vm12 = vcmp.ge.f32.partialorder %v736_v51, 0.0 }
 0x17c   : > { %v825_v17 = vadd.f32 %v824_v58, %v2778_v31  ;;  %v2945_v25 = vpack.c.bf16 %v580_v34, %v579_v8  ;;  %v2121_v34 = vld [vmem:[%s3432_s5 + $0x40] sm:$0xf] }
 0x17d   : > { %v2939_v12 = vpop.f32.mrf.mxu1 }
 0x17e   : > { %v964_v21 = vmul.f32 0.01, %v825_v17  ;;  %vm900_vm15 = vcmp.ge.f32.partialorder %v825_v17, 0.0 }
 0x180   : > { %v1028_v32 = vsel %vm900_vm15, %v825_v17, %v964_v21  ;;  %v2122_v21 = vor.u32 %v2248_v48, %v2121_v34 }
 0x183   : > { %v826_v18 = vpop.f32.mrf.mxu2 }
 0x184   : > { %v827_v40 = vadd.f32 %v826_v18, %v2778_v31 }
 0x185   : > { %v2943_v19 = vpop.f32.mrf.mxu1 }
 0x186   : > { %vm902_vm0 = vcmp.ge.f32.partialorder %v827_v40, 0.0  ;;  %v966_v24 = vmul.f32 0.01, %v827_v40 }
 0x188   : > { %779 = vmatmul.bf16.gmra.mxu3 %v2945_v25  ;;  %1497 = vmatmul.bf16.gmra.mxu1 %v2947_v27  ;;  %v1030_v36 = vsel %vm902_vm0, %v827_v40, %v966_v24 }
 0x189   : > { %1586 = vmatmul.bf16.gmra.mxu2 %v2886_v9  ;;  %v2955_v41 = vpack.c.bf16 %v1030_v36, %v1028_v32  ;;  %v726_v9 = vadd.f32 %v2881_v62, %v2884_v7  ;;  %v2138_v62 = vor.u32 %v2252_v56, %v2137_v14  ;;  %v1023_v32 = vsel %vm895_vm8, %v731_v54, %v959_v20  ;;  %v2089_v54 = vld [vmem:[%s3432_s5] sm:$0xf] }
 0x18a   : > { %v963_v14 = vmul.f32 0.01, %v736_v51 }
 0x18b   : > { %v829_v49 = vpop.f32.mrf.mxu2  ;;  %1423 = vmatmul.bf16.gmra.mxu0 %v2955_v41  ;;  %v955_v0 = vmul.f32 0.01, %v726_v9  ;;  %vm891_vm4 = vcmp.ge.f32.partialorder %v726_v9, 0.0  ;;  %1302 = vmatpush.bf16.msrb.mxu3 %v2138_v62 }
 0x18c   : > { %v830_v55 = vadd.f32 %v829_v49, %v2778_v31  ;;  %v2114_v49 = vor.u32 %v2246_v47, %v2113_v45  ;;  %v1027_v60 = vsel %vm899_vm12, %v736_v51, %v963_v14 }
 0x18d   : > { %v2967_v5 = vpop.f32.mrf.mxu1  ;;  %v1019_v2 = vsel %vm891_vm4, %v726_v9, %v955_v0 }
 0x18e   : > { %v968_v22 = vmul.f32 0.01, %v830_v55  ;;  %vm904_vm5 = vcmp.ge.f32.partialorder %v830_v55, 0.0  ;;  %v2981_v52 = vpack.c.bf16 %v1021_v61, %v1019_v2 }
 0x18f   : > { %1303 = vmatpush.bf16.msrb.mxu3 %v2130_v50  ;;  %v741_v50 = vadd.f32 %v2943_v19, %v2884_v7 }
 0x190   : > { %v1032_v10 = vsel %vm904_vm5, %v830_v55, %v968_v22  ;;  %v2105_v55 = vld [vmem:[%s3432_s5 + $0x20] sm:$0xf] }
 0x191   : > { %vm903_vm0 = vcmp.ge.f32.partialorder %v741_v50, 0.0 }
 0x193   : > { %v831_v57 = vpop.f32.mrf.mxu2  ;;  %1304 = vmatpush.bf16.msrb.mxu3 %v2122_v21 }
 0x194   : > { %v832_v37 = vadd.f32 %v831_v57, %v2778_v31 }
 0x195   : > { %v2977_v63 = vpop.f32.mrf.mxu1 }
 0x196   : > { %vm906_vm6 = vcmp.ge.f32.partialorder %v832_v37, 0.0  ;;  %v970_v3 = vmul.f32 0.01, %v832_v37  ;;  %v746_v45 = vadd.f32 %v2977_v63, %v2884_v7 }
 0x197   : > { %1305 = vmatpush.bf16.msrb.mxu3 %v2114_v49 }
 0x198   : > { %784 = vmatmul.bf16.gmra.mxu3 %v2979_v6  ;;  %1502 = vmatmul.bf16.gmra.mxu1 %v2981_v52  ;;  %v1034_v58 = vsel %vm906_vm6, %v832_v37, %v970_v3  ;;  %v2097_v3 = vld [vmem:[%s3432_s5 + $0x10] sm:$0xf]  ;;  %vm907_vm4 = vcmp.ge.f32.partialorder %v746_v45, 0.0 }
 0x199   : > { %1591 = vmatmul.bf16.gmra.mxu2 %v2908_v39  ;;  %v2989_v15 = vpack.c.bf16 %v1034_v58, %v1032_v10  ;;  %v961_v39 = vmul.f32 0.01, %v733_v16  ;;  %v2242_v58 = vld [vmem:[%s3432_s5 + $0x14] sm:$0xf0] }
 0x19a   : > { %v2098_v11 = vor.u32 %v2242_v58, %v2097_v3  ;;  %v3108_v3 = vld [vmem:[%s3433_s6] sm:$0x3] }
 0x19b   : > { %v834_v17 = vpop.f32.mrf.mxu2  ;;  %1428 = vmatmul.bf16.gmra.mxu0 %v2989_v15  ;;  %v1025_v23 = vsel %vm897_vm7, %v733_v16, %v961_v39  ;;  %v967_v39 = vmul.f32 0.01, %v741_v50 }
 0x19c   : > { %v835_v8 = vadd.f32 %v834_v17, %v2778_v31  ;;  %v3011_v38 = vpack.c.bf16 %v1025_v23, %v1023_v32 }
 0x19d   : > { %v2999_v18 = vpop.f32.mrf.mxu1 }
 0x19e   : > { %v972_v26 = vmul.f32 0.01, %v835_v8  ;;  %vm908_vm9 = vcmp.ge.f32.partialorder %v835_v8, 0.0 }
 0x1a0   : > { %v1036_v42 = vsel %vm908_vm9, %v835_v8, %v972_v26 }
 0x1a3   : > { %v836_v40 = vpop.f32.mrf.mxu2 }
 0x1a4   : > { %v837_v24 = vadd.f32 %v836_v40, %v2778_v31  ;;  %v1031_v40 = vsel %vm903_vm0, %v741_v50, %v967_v39 }
 0x1a5   : > { %v3009_v28 = vpop.f32.mrf.mxu1 }
 0x1a6   : > { %vm910_vm10 = vcmp.ge.f32.partialorder %v837_v24, 0.0  ;;  %v974_v36 = vmul.f32 0.01, %v837_v24 }
 0x1a8   : > { %858 = vmatmul.bf16.vlgmr.msra.gmra.mxu3 %v2903_v35  ;;  %1507 = vmatmul.bf16.gmra.mxu1 %v3011_v38  ;;  %v1038_v44 = vsel %vm910_vm10, %v837_v24, %v974_v36  ;;  %v738_v35 = vadd.f32 %v2939_v12, %v2884_v7  ;;  %v2244_v12 = vld [vmem:[%s3432_s5 + $0x24] sm:$0xf0] }
 0x1a9   : > { %1596 = vmatmul.bf16.gmra.mxu2 %v2930_v4  ;;  %v3019_v46 = vpack.c.bf16 %v1038_v44, %v1036_v42  ;;  %v2106_v0 = vor.u32 %v2244_v12, %v2105_v55  ;;  %v748_v42 = vadd.f32 %v2999_v18, %v2884_v7 }
 0x1aa   : > { %v965_v4 = vmul.f32 0.01, %v738_v35  ;;  %vm901_vm11 = vcmp.ge.f32.partialorder %v738_v35, 0.0 }
 0x1ab   : > { %v839_v9 = vpop.f32.mrf.mxu2  ;;  %1433 = vmatmul.bf16.gmra.mxu0 %v3019_v46  ;;  %1306 = vmatpush.bf16.msrb.mxu3 %v2106_v0  ;;  %vm909_vm3 = vcmp.ge.f32.partialorder %v748_v42, 0.0 }
 0x1ac   : > { %v840_v13 = vadd.f32 %v839_v9, %v2778_v31  ;;  %v1029_v62 = vsel %vm901_vm11, %v738_v35, %v965_v4  ;;  %v971_v35 = vmul.f32 0.01, %v746_v45 }
 0x1ad   : > { %v3029_v53 = vpop.f32.mrf.mxu1  ;;  %v3041_v22 = vpack.c.bf16 %v1029_v62, %v1027_v60 }
 0x1ae   : > { %v976_v33 = vmul.f32 0.01, %v840_v13  ;;  %vm912_vm13 = vcmp.ge.f32.partialorder %v840_v13, 0.0 }
 0x1af   : > { %1307 = vmatpush.bf16.msrb.mxu3 %v2098_v11 }
 0x1b0   : > { %v1040_v37 = vsel %vm912_vm13, %v840_v13, %v976_v33  ;;  %v1035_v13 = vsel %vm907_vm4, %v746_v45, %v971_v35  ;;  %v751_v33 = vadd.f32 %v3009_v28, %v2884_v7 }
 0x1b2   : > { %vm911_vm8 = vcmp.ge.f32.partialorder %v751_v33, 0.0 }
 0x1b3   : > { %v841_v56 = vpop.f32.mrf.mxu2 }
 0x1b4   : > { %v842_v57 = vadd.f32 %v841_v56, %v2778_v31  ;;  %v753_v56 = vadd.f32 %v3029_v53, %v2884_v7 }
 0x1b5   : > { %v3039_v59 = vpop.f32.mrf.mxu1 }
 0x1b6   : > { %vm914_vm14 = vcmp.ge.f32.partialorder %v842_v57, 0.0  ;;  %v978_v61 = vmul.f32 0.01, %v842_v57  ;;  %vm913_vm7 = vcmp.ge.f32.partialorder %v753_v56, 0.0 }
 0x1b8   : > { %863 = vmatmul.bf16.gmra.mxu3 %v2923_v1  ;;  %1512 = vmatmul.bf16.gmra.mxu1 %v3041_v22  ;;  %v1042_v2 = vsel %vm914_vm14, %v842_v57, %v978_v61  ;;  %v743_v1 = vadd.f32 %v2967_v5, %v2884_v7  ;;  %v2240_v5 = vld [vmem:[%s3432_s5 + $0x4] sm:$0xf0]  ;;  %v975_v61 = vmul.f32 0.01, %v751_v33 }
 0x1b9   : > { %1601 = vmatmul.bf16.gmra.mxu2 %v2955_v41  ;;  %v3049_v10 = vpack.c.bf16 %v1042_v2, %v1040_v37  ;;  %v2090_v8 = vor.u32 %v2240_v5, %v2089_v54 }
 0x1ba   : > { %v969_v41 = vmul.f32 0.01, %v743_v1  ;;  %vm905_vm15 = vcmp.ge.f32.partialorder %v743_v1, 0.0  ;;  %v1039_v58 = vsel %vm911_vm8, %v751_v33, %v975_v61 }
 0x1bb   : > { %v844_v29 = vpop.f32.mrf.mxu2  ;;  %1438 = vmatmul.bf16.gmra.mxu0 %v3049_v10  ;;  %1308 = vmatpush.bf16.msrb.mxu3 %v2090_v8  ;;  %v756_v8 = vadd.f32 %v3039_v59, %v2884_v7 }
 0x1bc   : > { %v845_v17 = vadd.f32 %v844_v29, %v2778_v31  ;;  %v1033_v20 = vsel %vm905_vm15, %v743_v1, %v969_v41  ;;  %v3113_v29 = vperm.slane %v3108_v3, 1 }
 0x1bd   : > { %v3059_v16 = vpop.f32.mrf.mxu1  ;;  %v3071_v26 = vpack.c.bf16 %v1033_v20, %v1031_v40  ;;  %vm915_vm13 = vcmp.ge.f32.partialorder %v756_v8, 0.0 }
 0x1be   : > { %v980_v19 = vmul.f32 0.01, %v845_v17  ;;  %vm916_vm1 = vcmp.ge.f32.partialorder %v845_v17, 0.0  ;;  %v758_v54 = vadd.f32 %v3059_v16, %v2884_v7 }
 0x1c0   : > { %v1044_v24 = vsel %vm916_vm1, %v845_v17, %v980_v19  ;;  %v981_v20 = vmul.f32 0.01, %v758_v54  ;;  %vm917_vm12 = vcmp.ge.f32.partialorder %v758_v54, 0.0 }
 0x1c3   : > { %v846_v34 = vpop.f32.mrf.mxu2 }
 0x1c4   : > { %v847_v48 = vadd.f32 %v846_v34, %v2778_v31 }
 0x1c5   : > { %v3069_v21 = vpop.f32.mrf.mxu1 }
 0x1c6   : > { %vm918_vm2 = vcmp.ge.f32.partialorder %v847_v48, 0.0  ;;  %v982_v23 = vmul.f32 0.01, %v847_v48 }
 0x1c8   : > { %868 = vmatmul.bf16.gmra.mxu3 %v2945_v25  ;;  %1517 = vmatmul.bf16.gmra.mxu1 %v3071_v26  ;;  %v1046_v32 = vsel %vm918_vm2, %v847_v48, %v982_v23  ;;  %v973_v25 = vmul.f32 0.01, %v748_v42  ;;  %v979_v48 = vmul.f32 0.01, %v756_v8 }
 0x1c9   : > { %1606 = vmatmul.bf16.gmra.mxu2 %v2989_v15  ;;  %v3076_v36 = vpack.c.bf16 %v1046_v32, %v1044_v24  ;;  %v1045_v24 = vsel %vm917_vm12, %v758_v54, %v981_v20 }
 0x1ca   : > { %v1037_v9 = vsel %vm909_vm3, %v748_v42, %v973_v25 }
 0x1cb   : > { %v849_v44 = vpop.f32.mrf.mxu2  ;;  %1443 = vmatmul.bf16.gmra.mxu0 %v3076_v36  ;;  %v3089_v63 = vpack.c.bf16 %v1037_v9, %v1035_v13 }
 0x1cc   : > { %v850_v49 = vadd.f32 %v849_v44, %v2778_v31  ;;  %v1043_v44 = vsel %vm915_vm13, %v756_v8, %v979_v48 }
 0x1cd   : > { %v3083_v47 = vpop.f32.mrf.mxu1  ;;  %v3137_v45 = vpack.c.bf16 %v1045_v24, %v1043_v44 }
 0x1ce   : > { %v984_v51 = vmul.f32 0.01, %v850_v49  ;;  %vm920_vm5 = vcmp.ge.f32.partialorder %v850_v49, 0.0  ;;  %v763_v35 = vadd.f32 %v3083_v47, %v2884_v7 }
 0x1d0   : > { %v1048_v14 = vsel %vm920_vm5, %v850_v49, %v984_v51  ;;  %vm921_vm0 = vcmp.ge.f32.partialorder %v763_v35, 0.0 }
 0x1d3   : > { %v851_v15 = vpop.f32.mrf.mxu2 }
 0x1d4   : > { %v852_v4 = vadd.f32 %v851_v15, %v2778_v31 }
 0x1d5   : > { %v3087_v18 = vpop.f32.mrf.mxu1 }
 0x1d6   : > { %vm922_vm6 = vcmp.ge.f32.partialorder %v852_v4, 0.0  ;;  %v986_v55 = vmul.f32 0.01, %v852_v4 }
 0x1d8   : > { %873 = vmatmul.bf16.gmra.mxu3 %v2979_v6  ;;  %1522 = vmatmul.bf16.gmra.mxu1 %v3089_v63  ;;  %v1050_v12 = vsel %vm922_vm6, %v852_v4, %v986_v55  ;;  %v977_v6 = vmul.f32 0.01, %v753_v56  ;;  %v761_v4 = vadd.f32 %v3069_v21, %v2884_v7  ;;  %v985_v55 = vmul.f32 0.01, %v763_v35 }
 0x1d9   : > { %1611 = vmatmul.bf16.gmra.mxu2 %v3019_v46  ;;  %v3094_v0 = vpack.c.bf16 %v1050_v12, %v1048_v14 }
 0x1da   : > { %v1041_v37 = vsel %vm913_vm7, %v753_v56, %v977_v6  ;;  %vm919_vm1 = vcmp.ge.f32.partialorder %v761_v4, 0.0 }
 0x1db   : > { %v854_v62 = vpop.f32.mrf.mxu2  ;;  %1448 = vmatmul.bf16.gmra.mxu0 %v3094_v0  ;;  %v3110_v1 = vpack.c.bf16 %v1041_v37, %v1039_v58 }
 0x1dc   : > { %v855_v60 = vadd.f32 %v854_v62, %v2778_v31  ;;  %v1049_v62 = vsel %vm921_vm0, %v763_v35, %v985_v55 }
 0x1dd   : > { %v3101_v57 = vpop.f32.mrf.mxu1 }
 0x1de   : > { %v988_v2 = vmul.f32 0.01, %v855_v60  ;;  %vm924_vm9 = vcmp.ge.f32.partialorder %v855_v60, 0.0 }
 0x1e0   : > { %v1052_v50 = vsel %vm924_vm9, %v855_v60, %v988_v2  ;;  %v768_v2 = vadd.f32 %v3101_v57, %v2884_v7 }
 0x1e2   : > { %vm925_vm4 = vcmp.ge.f32.partialorder %v768_v2, 0.0 }
 0x1e3   : > { %v856_v46 = vpop.f32.mrf.mxu2 }
 0x1e4   : > { %v857_v53 = vadd.f32 %v856_v46, %v2778_v31 }
 0x1e5   : > { %v1488_v28 = vpop.f32.mrf.mxu1 }
 0x1e6   : > { %vm926_vm10 = vcmp.ge.f32.partialorder %v857_v53, 0.0  ;;  %v990_v11 = vmul.f32 0.01, %v857_v53  ;;  %v1489_v39 = vadd.f32 %v1488_v28, %v3113_v29 }
 0x1e8   : > { %1309 = vmatmul.bf16.vlgmr.msrb.gmra.mxu3 %v2901_v30  ;;  %1527 = vmatmul.bf16.gmra.mxu1 %v3110_v1  ;;  %v1054_v41 = vsel %vm926_vm10, %v857_v53, %v990_v11  ;;  %v766_v11 = vadd.f32 %v3087_v18, %v2884_v7 }
 0x1e9   : > { %1616 = vmatmul.bf16.gmra.mxu2 %v3049_v10  ;;  %v3118_v17 = vpack.c.bf16 %v1054_v41, %v1052_v50  ;;  %v989_v41 = vmul.f32 0.01, %v768_v2 }
 0x1ea   : > { %vm923_vm5 = vcmp.ge.f32.partialorder %v766_v11, 0.0 }
 0x1eb   : > { %v3124_v5 = vpop.f32.mrf.mxu3  ;;  %1453 = vmatmul.bf16.gmra.mxu0 %v3118_v17  ;;  %v1053_v8 = vsel %vm925_vm4, %v768_v2, %v989_v41 }
 0x1ec   : > { %v1577_v30 = vpop.f32.mrf.mxu2 }
 0x1ed   : > { %v1578_v34 = vadd.f32 %v1577_v30, %v1489_v39  ;;  %v1490_v10 = vpop.f32.mrf.mxu1 }
 0x1ee   : > { %v1491_v40 = vadd.f32 %v1490_v10, %v3113_v29 }
 0x1ef   : > { %vm1658_vm11 = vcmp.ge.f32.partialorder %v1578_v34, 0.0  ;;  %v1722_v19 = vmul.f32 0.01, %v1578_v34 }
 0x1f1   : > { %v1786_v16 = vsel %vm1658_vm11, %v1578_v34, %v1722_v19 }
 0x1f2   : > { %1850 = vst [vmem:[%s3131_s16 + $0x8] sm:$0xff] %v1786_v16 }
 0x1f3   : > { %v3135_v23 = vpop.f32.mrf.mxu3 }
 0x1f4   : > { %v1579_v59 = vpop.f32.mrf.mxu2 }
 0x1f5   : > { %v1580_v32 = vadd.f32 %v1579_v59, %v1491_v40  ;;  %v1493_v42 = vpop.f32.mrf.mxu1  ;;  %v773_v40 = vadd.f32 %v3135_v23, %v2884_v7 }
 0x1f6   : > { %v1494_v15 = vadd.f32 %v1493_v42, %v3113_v29  ;;  %v771_v42 = vadd.f32 %v3124_v5, %v2884_v7 }
 0x1f7   : > { %vm1660_vm14 = vcmp.ge.f32.partialorder %v1580_v32, 0.0  ;;  %v1724_v25 = vmul.f32 0.01, %v1580_v32  ;;  %vm929_vm8 = vcmp.ge.f32.partialorder %v773_v40, 0.0 }
 0x1f8   : > { %1314 = vmatmul.bf16.gmra.mxu3 %v2925_v43  ;;  %1532 = vmatmul.bf16.gmra.mxu1 %v3137_v45  ;;  %vm927_vm9 = vcmp.ge.f32.partialorder %v771_v42, 0.0 }
 0x1f9   : > { %v1788_v49 = vsel %vm1660_vm14, %v1580_v32, %v1724_v25  ;;  %1621 = vmatmul.bf16.gmra.mxu2 %v3076_v36  ;;  %v983_v36 = vmul.f32 0.01, %v761_v4  ;;  %v993_v25 = vmul.f32 0.01, %v773_v40 }
 0x1fa   : > { %1852 = vst [vmem:[%s3131_s16 + $0x18] sm:$0xff] %v1788_v49 }
 0x1fb   : > { %v3146_v9 = vpop.f32.mrf.mxu3  ;;  %v1047_v21 = vsel %vm919_vm1, %v761_v4, %v983_v36 }
 0x1fc   : > { %v1582_v51 = vpop.f32.mrf.mxu2  ;;  %v3154_v61 = vpack.c.bf16 %v1049_v62, %v1047_v21 }
 0x1fd   : > { %v1583_v13 = vadd.f32 %v1582_v51, %v1494_v15  ;;  %v1495_v43 = vpop.f32.mrf.mxu1  ;;  %v1057_v51 = vsel %vm929_vm8, %v773_v40, %v993_v25 }
 0x1fe   : > { %v1496_v47 = vadd.f32 %v1495_v43, %v3113_v29 }
 0x1ff   : > { %vm1662_vm15 = vcmp.ge.f32.partialorder %v1583_v13, 0.0  ;;  %v1726_v14 = vmul.f32 0.01, %v1583_v13 }
 0x201   : > { %v1790_v12 = vsel %vm1662_vm15, %v1583_v13, %v1726_v14  ;;  %v3188_v13 = vpop.f32.mrf.mxu0 }
 0x202   : > { %1854 = vst [vmem:[%s3131_s16 + $0x28] sm:$0xff] %v1790_v12 }
 0x203   : > { %v3152_v56 = vpop.f32.mrf.mxu3 }
 0x204   : > { %v1584_v33 = vpop.f32.mrf.mxu2 }
 0x205   : > { %v1585_v6 = vadd.f32 %v1584_v33, %v1496_v47  ;;  %v1498_v60 = vpop.f32.mrf.mxu1  ;;  %v778_v47 = vadd.f32 %v3152_v56, %v2884_v7 }
 0x206   : > { %v1499_v53 = vadd.f32 %v1498_v60, %v3113_v29  ;;  %v776_v60 = vadd.f32 %v3146_v9, %v2884_v7 }
 0x207   : > { %vm1664_vm2 = vcmp.ge.f32.partialorder %v1585_v6, 0.0  ;;  %v1728_v46 = vmul.f32 0.01, %v1585_v6  ;;  %vm933_vm12 = vcmp.ge.f32.partialorder %v778_v47, 0.0 }
 0x208   : > { %1319 = vmatmul.bf16.gmra.mxu3 %v2947_v27  ;;  %1537 = vmatmul.bf16.gmra.mxu1 %v3154_v61  ;;  %vm931_vm13 = vcmp.ge.f32.partialorder %v776_v60, 0.0 }
 0x209   : > { %v1792_v37 = vsel %vm1664_vm2, %v1585_v6, %v1728_v46  ;;  %1626 = vmatmul.bf16.gmra.mxu2 %v3094_v0  ;;  %v987_v0 = vmul.f32 0.01, %v766_v11 }
 0x20a   : > { %1856 = vst [vmem:[%s3131_s16 + $0x38] sm:$0xff] %v1792_v37  ;;  %v3200_v37 = vpop.f32.mrf.mxu0 }
 0x20b   : > { %v3163_v28 = vpop.f32.mrf.mxu3  ;;  %v1051_v18 = vsel %vm923_vm5, %v766_v11, %v987_v0 }
 0x20c   : > { %v1587_v58 = vpop.f32.mrf.mxu2  ;;  %v3171_v19 = vpack.c.bf16 %v1053_v8, %v1051_v18 }
 0x20d   : > { %v1588_v50 = vadd.f32 %v1587_v58, %v1499_v53  ;;  %v1500_v27 = vpop.f32.mrf.mxu1  ;;  %v995_v58 = vmul.f32 0.01, %v776_v60 }
 0x20e   : > { %v1501_v57 = vadd.f32 %v1500_v27, %v3113_v29 }
 0x20f   : > { %vm1666_vm3 = vcmp.ge.f32.partialorder %v1588_v50, 0.0  ;;  %v1730_v54 = vmul.f32 0.01, %v1588_v50 }
 0x211   : > { %v1794_v39 = vsel %vm1666_vm3, %v1588_v50, %v1730_v54 }
 0x212   : > { %1858 = vst [vmem:[%s3131_s16 + $0x48] sm:$0xff] %v1794_v39 }
 0x213   : > { %v3169_v30 = vpop.f32.mrf.mxu3 }
 0x214   : > { %v1589_v34 = vpop.f32.mrf.mxu2 }
 0x215   : > { %v1590_v10 = vadd.f32 %v1589_v34, %v1501_v57  ;;  %v1503_v20 = vpop.f32.mrf.mxu1  ;;  %v1059_v57 = vsel %vm931_vm13, %v776_v60, %v995_v58 }
 0x216   : > { %v1504_v24 = vadd.f32 %v1503_v20, %v3113_v29 }
 0x217   : > { %vm1668_vm6 = vcmp.ge.f32.partialorder %v1590_v10, 0.0  ;;  %v1732_v48 = vmul.f32 0.01, %v1590_v10 }
 0x218   : > { %1324 = vmatmul.bf16.gmra.mxu3 %v2981_v52  ;;  %1542 = vmatmul.bf16.gmra.mxu1 %v3171_v19 }
 0x219   : > { %v1796_v16 = vsel %vm1668_vm6, %v1590_v10, %v1732_v48  ;;  %1631 = vmatmul.bf16.gmra.mxu2 %v3118_v17  ;;  %v991_v17 = vmul.f32 0.01, %v771_v42  ;;  %v3210_v48 = vpop.f32.mrf.mxu0 }
 0x21a   : > { %1860 = vst [vmem:[%s3131_s16 + $0x58] sm:$0xff] %v1796_v16 }
 0x21b   : > { %v3180_v59 = vpop.f32.mrf.mxu3  ;;  %v1055_v55 = vsel %vm927_vm9, %v771_v42, %v991_v17 }
 0x21c   : > { %v1592_v32 = vpop.f32.mrf.mxu2  ;;  %v3190_v14 = vpack.c.bf16 %v1057_v51, %v1055_v55 }
 0x21d   : > { %v1593_v44 = vadd.f32 %v1592_v32, %v1504_v24  ;;  %v1505_v52 = vpop.f32.mrf.mxu1  ;;  %v783_v24 = vadd.f32 %v3169_v30, %v2884_v7 }
 0x21e   : > { %v1506_v23 = vadd.f32 %v1505_v52, %v3113_v29 }
 0x21f   : > { %vm1670_vm7 = vcmp.ge.f32.partialorder %v1593_v44, 0.0  ;;  %v1734_v49 = vmul.f32 0.01, %v1593_v44  ;;  %vm937_vm2 = vcmp.ge.f32.partialorder %v783_v24, 0.0 }
 0x221   : > { %v1798_v35 = vsel %vm1670_vm7, %v1593_v44, %v1734_v49  ;;  %v1001_v49 = vmul.f32 0.01, %v783_v24  ;;  %v3220_v51 = vpop.f32.mrf.mxu0 }
 0x222   : > { %1862 = vst [vmem:[%s3131_s16 + $0x68] sm:$0xff] %v1798_v35 }
 0x223   : > { %v3186_v15 = vpop.f32.mrf.mxu3 }
 0x224   : > { %v1594_v4 = vpop.f32.mrf.mxu2 }
 0x225   : > { %v1595_v5 = vadd.f32 %v1594_v4, %v1506_v23  ;;  %v1508_v43 = vpop.f32.mrf.mxu1 }
 0x226   : > { %v1509_v62 = vadd.f32 %v1508_v43, %v3113_v29  ;;  %v1065_v43 = vsel %vm937_vm2, %v783_v24, %v1001_v49 }
 0x227   : > { %vm1672_vm10 = vcmp.ge.f32.partialorder %v1595_v5, 0.0  ;;  %v1736_v36 = vmul.f32 0.01, %v1595_v5 }
 0x228   : > { %1329 = vmatmul.bf16.gmra.mxu3 %v3011_v38  ;;  %1547 = vmatmul.bf16.gmra.mxu1 %v3190_v14  ;;  %v997_v38 = vmul.f32 0.01, %v778_v47 }
 0x229   : > { %v1800_v12 = vsel %vm1672_vm10, %v1595_v5, %v1736_v36 }
 0x22a   : > { %1864 = vst [vmem:[%s3131_s16 + $0x78] sm:$0xff] %v1800_v12  ;;  %v1061_v27 = vsel %vm933_vm12, %v778_v47, %v997_v38 }
 0x22b   : > { %v859_v33 = vpop.f32.mrf.mxu3  ;;  %v3206_v34 = vpack.c.bf16 %v1061_v27, %v1059_v57 }
 0x22c   : > { %v1597_v6 = vpop.f32.mrf.mxu2  ;;  %v860_v53 = vadd.f32 %v859_v33, %v2778_v31 }
 0x22d   : > { %v1598_v21 = vadd.f32 %v1597_v6, %v1509_v62  ;;  %v1510_v46 = vpop.f32.mrf.mxu1 }
 0x22e   : > { %v1511_v11 = vadd.f32 %v1510_v46, %v3113_v29  ;;  %v992_v41 = vmul.f32 0.01, %v860_v53  ;;  %vm928_vm14 = vcmp.ge.f32.partialorder %v860_v53, 0.0 }
 0x22f   : > { %vm1674_vm11 = vcmp.ge.f32.partialorder %v1598_v21, 0.0  ;;  %v1738_v2 = vmul.f32 0.01, %v1598_v21 }
 0x230   : > { %v1056_v20 = vsel %vm928_vm14, %v860_v53, %v992_v41  ;;  %v788_v53 = vadd.f32 %v3186_v15, %v2884_v7 }
 0x231   : > { %v1802_v56 = vsel %vm1674_vm11, %v1598_v21, %v1738_v2 }
 0x232   : > { %1866 = vst [vmem:[%s3131_s16 + $0x88] sm:$0xff] %v1802_v56  ;;  %vm941_vm8 = vcmp.ge.f32.partialorder %v788_v53, 0.0 }
 0x233   : > { %v861_v50 = vpop.f32.mrf.mxu3 }
 0x234   : > { %v862_v9 = vadd.f32 %v861_v50, %v2778_v31  ;;  %v1599_v54 = vpop.f32.mrf.mxu2  ;;  %v3232_v50 = vpop.f32.mrf.mxu0 }
 0x235   : > { %v1600_v0 = vadd.f32 %v1599_v54, %v1511_v11  ;;  %v1513_v39 = vpop.f32.mrf.mxu1 }
 0x236   : > { %vm930_vm15 = vcmp.ge.f32.partialorder %v862_v9, 0.0  ;;  %v994_v8 = vmul.f32 0.01, %v862_v9  ;;  %v1514_v32 = vadd.f32 %v1513_v39, %v3113_v29 }
 0x237   : > { %vm1676_vm0 = vcmp.ge.f32.partialorder %v1600_v0, 0.0  ;;  %v1740_v10 = vmul.f32 0.01, %v1600_v0 }
 0x238   : > { %1334 = vmatmul.bf16.gmra.mxu3 %v3041_v22  ;;  %1552 = vmatmul.bf16.gmra.mxu1 %v3206_v34  ;;  %v1058_v18 = vsel %vm930_vm15, %v862_v9, %v994_v8  ;;  %v781_v22 = vadd.f32 %v3163_v28, %v2884_v7  ;;  %v1005_v9 = vmul.f32 0.01, %v788_v53 }
 0x239   : > { %v1804_v16 = vsel %vm1676_vm0, %v1600_v0, %v1740_v10  ;;  %v1096_v40 = vpack.c.bf16 %v1058_v18, %v1056_v20 }
 0x23a   : > { %1868 = vst [vmem:[%s3131_s16 + $0x98] sm:$0xff] %v1804_v16  ;;  %v999_v23 = vmul.f32 0.01, %v781_v22  ;;  %vm935_vm3 = vcmp.ge.f32.partialorder %v781_v22, 0.0  ;;  %v1069_v10 = vsel %vm941_vm8, %v788_v53, %v1005_v9 }
 0x23b   : > { %v864_v42 = vpop.f32.mrf.mxu3  ;;  %1458 = vmatmul.bf16.gmra.mxu0 %v1096_v40  ;;  %1636 = vmatmul.bf16.gmra.mxu2 %v1096_v40 }
 0x23c   : > { %v1602_v44 = vpop.f32.mrf.mxu2  ;;  %v865_v35 = vadd.f32 %v864_v42, %v2778_v31  ;;  %v1063_v62 = vsel %vm935_vm3, %v781_v22, %v999_v23  ;;  %v3242_v42 = vpop.f32.mrf.mxu0 }
 0x23d   : > { %v1603_v52 = vadd.f32 %v1602_v44, %v1514_v32  ;;  %v1515_v25 = vpop.f32.mrf.mxu1  ;;  %v3224_v6 = vpack.c.bf16 %v1065_v43, %v1063_v62 }
 0x23e   : > { %v1516_v4 = vadd.f32 %v1515_v25, %v3113_v29  ;;  %v996_v55 = vmul.f32 0.01, %v865_v35  ;;  %vm932_vm4 = vcmp.ge.f32.partialorder %v865_v35, 0.0 }
 0x23f   : > { %vm1678_vm1 = vcmp.ge.f32.partialorder %v1603_v52, 0.0  ;;  %v1742_v17 = vmul.f32 0.01, %v1603_v52 }
 0x240   : > { %v1060_v21 = vsel %vm932_vm4, %v865_v35, %v996_v55 }
 0x241   : > { %v1806_v30 = vsel %vm1678_vm1, %v1603_v52, %v1742_v17 }
 0x242   : > { %1870 = vst [vmem:[%s3131_s16 + $0xa8] sm:$0xff] %v1806_v30 }
 0x243   : > { %v866_v5 = vpop.f32.mrf.mxu3 }
 0x244   : > { %v867_v28 = vadd.f32 %v866_v5, %v2778_v31  ;;  %v1604_v36 = vpop.f32.mrf.mxu2  ;;  %v3249_v43 = vpop.f32.mrf.mxu0 }
 0x245   : > { %v1605_v12 = vadd.f32 %v1604_v36, %v1516_v4  ;;  %v1518_v47 = vpop.f32.mrf.mxu1 }
 0x246   : > { %vm934_vm5 = vcmp.ge.f32.partialorder %v867_v28, 0.0  ;;  %v998_v33 = vmul.f32 0.01, %v867_v28  ;;  %v1519_v58 = vadd.f32 %v1518_v47, %v3113_v29 }
 0x247   : > { %vm1680_vm6 = vcmp.ge.f32.partialorder %v1605_v12, 0.0  ;;  %v1744_v60 = vmul.f32 0.01, %v1605_v12 }
 0x248   : > { %1339 = vmatmul.bf16.gmra.mxu3 %v3071_v26  ;;  %1557 = vmatmul.bf16.gmra.mxu1 %v3224_v6  ;;  %v1062_v46 = vsel %vm934_vm5, %v867_v28, %v998_v33  ;;  %v786_v26 = vadd.f32 %v3180_v59, %v2884_v7 }
 0x249   : > { %v1808_v38 = vsel %vm1680_vm6, %v1605_v12, %v1744_v60  ;;  %v1098_v2 = vpack.c.bf16 %v1062_v46, %v1060_v21 }
 0x24a   : > { %1872 = vst [vmem:[%s3131_s16 + $0xb8] sm:$0xff] %v1808_v38  ;;  %v1003_v0 = vmul.f32 0.01, %v786_v26  ;;  %vm939_vm9 = vcmp.ge.f32.partialorder %v786_v26, 0.0  ;;  %v3256_v38 = vperm.slane %v3108_v3, 0 }
 0x24b   : > { %v869_v56 = vpop.f32.mrf.mxu3  ;;  %1463 = vmatmul.bf16.gmra.mxu0 %v1098_v2  ;;  %1641 = vmatmul.bf16.gmra.mxu2 %v1098_v2 }
 0x24c   : > { %v1607_v11 = vpop.f32.mrf.mxu2  ;;  %v870_v15 = vadd.f32 %v869_v56, %v2778_v31  ;;  %v1067_v40 = vsel %vm939_vm9, %v786_v26, %v1003_v0 }
 0x24d   : > { %v1608_v27 = vadd.f32 %v1607_v11, %v1519_v58  ;;  %v1520_v41 = vpop.f32.mrf.mxu1  ;;  %v3240_v32 = vpack.c.bf16 %v1069_v10, %v1067_v40  ;;  %v3259_v11 = vpop.f32.mrf.mxu0 }
 0x24e   : > { %v1521_v57 = vadd.f32 %v1520_v41, %v3113_v29  ;;  %v1000_v20 = vmul.f32 0.01, %v870_v15  ;;  %vm936_vm10 = vcmp.ge.f32.partialorder %v870_v15, 0.0 }
 0x24f   : > { %vm1682_vm7 = vcmp.ge.f32.partialorder %v1608_v27, 0.0  ;;  %v1746_v54 = vmul.f32 0.01, %v1608_v27 }
 0x250   : > { %v1064_v22 = vsel %vm936_vm10, %v870_v15, %v1000_v20 }
 0x251   : > { %v1810_v39 = vsel %vm1682_vm7, %v1608_v27, %v1746_v54 }
 0x252   : > { %1874 = vst [vmem:[%s3131_s16 + $0xc8] sm:$0xff] %v1810_v39 }
 0x253   : > { %v871_v8 = vpop.f32.mrf.mxu3 }
 0x254   : > { %v872_v18 = vadd.f32 %v871_v8, %v2778_v31  ;;  %v1609_v7 = vpop.f32.mrf.mxu2 }
 0x255   : > { %v1610_v59 = vadd.f32 %v1609_v7, %v1521_v57  ;;  %v1523_v16 = vpop.f32.mrf.mxu1 }
 0x256   : > { %vm938_vm11 = vcmp.ge.f32.partialorder %v872_v18, 0.0  ;;  %v1002_v24 = vmul.f32 0.01, %v872_v18  ;;  %v1524_v17 = vadd.f32 %v1523_v16, %v3113_v29 }
 0x257   : > { %vm1684_vm12 = vcmp.ge.f32.partialorder %v1610_v59, 0.0  ;;  %v1748_v44 = vmul.f32 0.01, %v1610_v59 }
 0x258   : > { %1344 = vmatmul.bf16.gmra.mxu3 %v3089_v63  ;;  %1562 = vmatmul.bf16.gmra.mxu1 %v3240_v32  ;;  %v1066_v52 = vsel %vm938_vm11, %v872_v18, %v1002_v24 }
 0x259   : > { %v1812_v25 = vsel %vm1684_vm12, %v1610_v59, %v1748_v44  ;;  %v1100_v49 = vpack.c.bf16 %v1066_v52, %v1064_v22 }
 0x25a   : > { %1876 = vst [vmem:[%s3131_s16 + $0xd8] sm:$0xff] %v1812_v25 }
 0x25b   : > { %v874_v35 = vpop.f32.mrf.mxu3  ;;  %1468 = vmatmul.bf16.gmra.mxu0 %v1100_v49  ;;  %1646 = vmatmul.bf16.gmra.mxu2 %v1100_v49 }
 0x25c   : > { %v1612_v23 = vpop.f32.mrf.mxu2  ;;  %v875_v63 = vadd.f32 %v874_v35, %v2778_v31 }
 0x25d   : > { %v1613_v30 = vadd.f32 %v1612_v23, %v1524_v17  ;;  %v1525_v4 = vpop.f32.mrf.mxu1  ;;  %v3275_v23 = vpop.f32.mrf.mxu0 }
 0x25e   : > { %v1526_v28 = vadd.f32 %v1525_v4, %v3113_v29  ;;  %v1004_v12 = vmul.f32 0.01, %v875_v63  ;;  %vm940_vm14 = vcmp.ge.f32.partialorder %v875_v63, 0.0 }
 0x25f   : > { %vm1686_vm13 = vcmp.ge.f32.partialorder %v1613_v30, 0.0  ;;  %v1750_v5 = vmul.f32 0.01, %v1613_v30 }
 0x260   : > { %v1068_v2 = vsel %vm940_vm14, %v875_v63, %v1004_v12 }
 0x261   : > { %v1814_v55 = vsel %vm1686_vm13, %v1613_v30, %v1750_v5 }
 0x262   : > { %1878 = vst [vmem:[%s3131_s16 + $0xe8] sm:$0xff] %v1814_v55 }
 0x263   : > { %v876_v36 = vpop.f32.mrf.mxu3 }
 0x264   : > { %v877_v47 = vadd.f32 %v876_v36, %v2778_v31  ;;  %v1614_v62 = vpop.f32.mrf.mxu2 }
 0x265   : > { %v1615_v33 = vadd.f32 %v1614_v62, %v1526_v28  ;;  %v1528_v60 = vpop.f32.mrf.mxu1 }
 0x266   : > { %vm942_vm15 = vcmp.ge.f32.partialorder %v877_v47, 0.0  ;;  %v1006_v21 = vmul.f32 0.01, %v877_v47  ;;  %v1529_v31 = vadd.f32 %v1528_v60, %v3113_v29 }
 0x267   : > { %vm1688_vm0 = vcmp.ge.f32.partialorder %v1615_v33, 0.0  ;;  %v1752_v46 = vmul.f32 0.01, %v1615_v33 }
 0x268   : > { %1349 = vmatmul.bf16.gmra.mxu3 %v3110_v1  ;;  %v1070_v53 = vsel %vm942_vm15, %v877_v47, %v1006_v21  ;;  %v3284_v21 = vpop.f32.mrf.mxu0 }
 0x269   : > { %v1816_v58 = vsel %vm1688_vm0, %v1615_v33, %v1752_v46  ;;  %v1102_v56 = vpack.c.bf16 %v1070_v53, %v1068_v2 }
 0x26a   : > { %1880 = vst [vmem:[%s3131_s16 + $0xf8] sm:$0xff] %v1816_v58 }
 0x26b   : > { %v1310_v26 = vpop.f32.mrf.mxu3  ;;  %1473 = vmatmul.bf16.gmra.mxu0 %v1102_v56  ;;  %1651 = vmatmul.bf16.gmra.mxu2 %v1102_v56 }
 0x26c   : > { %v1311_v27 = vadd.f32 %v1310_v26, %v3256_v38  ;;  %v1617_v1 = vpop.f32.mrf.mxu2 }
 0x26d   : > { %v1618_v41 = vadd.f32 %v1617_v1, %v1529_v31  ;;  %v1530_v3 = vpop.f32.mrf.mxu1 }
 0x26e   : > { %v1400_v9 = vadd.f32 %v3188_v13, %v1311_v27  ;;  %v1531_v57 = vadd.f32 %v1530_v3, %v3113_v29 }
 0x26f   : > { %vm1690_vm1 = vcmp.ge.f32.partialorder %v1618_v41, 0.0  ;;  %v1754_v54 = vmul.f32 0.01, %v1618_v41 }
 0x270   : > { %vm1657_vm2 = vcmp.ge.f32.partialorder %v1400_v9, 0.0  ;;  %v1721_v15 = vmul.f32 0.01, %v1400_v9 }
 0x271   : > { %v1818_v0 = vsel %vm1690_vm1, %v1618_v41, %v1754_v54 }
 0x272   : > { %v1785_v39 = vsel %vm1657_vm2, %v1400_v9, %v1721_v15  ;;  %1882 = vst [vmem:[%s3131_s16 + $0x108] sm:$0xff] %v1818_v0  ;;  %v3294_v15 = vpop.f32.mrf.mxu0 }
 0x273   : > { %1849 = vst [vmem:[%s3131_s16] sm:$0xff] %v1785_v39  ;;  %v1312_v8 = vpop.f32.mrf.mxu3 }
 0x274   : > { %v1313_v10 = vadd.f32 %v1312_v8, %v3256_v38  ;;  %v1619_v20 = vpop.f32.mrf.mxu2 }
 0x275   : > { %v1620_v18 = vadd.f32 %v1619_v20, %v1531_v57  ;;  %v1533_v7 = vpop.f32.mrf.mxu1 }
 0x276   : > { %v1402_v13 = vadd.f32 %v3200_v37, %v1313_v10  ;;  %v1534_v44 = vadd.f32 %v1533_v7, %v3113_v29 }
 0x277   : > { %vm1692_vm3 = vcmp.ge.f32.partialorder %v1620_v18, 0.0  ;;  %v1756_v59 = vmul.f32 0.01, %v1620_v18 }
 0x278   : > { %vm1659_vm4 = vcmp.ge.f32.partialorder %v1402_v13, 0.0  ;;  %v1723_v16 = vmul.f32 0.01, %v1402_v13  ;;  %1354 = vmatmul.bf16.gmra.mxu3 %v3137_v45 }
 0x279   : > { %v1820_v40 = vsel %vm1692_vm3, %v1620_v18, %v1756_v59 }
 0x27a   : > { %v1787_v24 = vsel %vm1659_vm4, %v1402_v13, %v1723_v16  ;;  %1884 = vst [vmem:[%s3131_s16 + $0x118] sm:$0xff] %v1820_v40  ;;  %v3303_v40 = vpop.f32.mrf.mxu0 }
 0x27b   : > { %1851 = vst [vmem:[%s3131_s16 + $0x10] sm:$0xff] %v1787_v24  ;;  %v1315_v22 = vpop.f32.mrf.mxu3 }
 0x27c   : > { %v1316_v52 = vadd.f32 %v1315_v22, %v3256_v38  ;;  %v1622_v25 = vpop.f32.mrf.mxu2 }
 0x27d   : > { %v1623_v49 = vadd.f32 %v1622_v25, %v1534_v44  ;;  %v1535_v37 = vpop.f32.mrf.mxu1 }
 0x27e   : > { %v1405_v17 = vadd.f32 %v3210_v48, %v1316_v52  ;;  %v1536_v5 = vadd.f32 %v1535_v37, %v3113_v29 }
 0x27f   : > { %vm1694_vm5 = vcmp.ge.f32.partialorder %v1623_v49, 0.0  ;;  %v1758_v35 = vmul.f32 0.01, %v1623_v49 }
 0x280   : > { %vm1661_vm6 = vcmp.ge.f32.partialorder %v1405_v17, 0.0  ;;  %v1725_v45 = vmul.f32 0.01, %v1405_v17 }
 0x281   : > { %v1822_v30 = vsel %vm1694_vm5, %v1623_v49, %v1758_v35 }
 0x282   : > { %v1789_v4 = vsel %vm1661_vm6, %v1405_v17, %v1725_v45  ;;  %1886 = vst [vmem:[%s3131_s16 + $0x128] sm:$0xff] %v1822_v30 }
 0x283   : > { %1853 = vst [vmem:[%s3131_s16 + $0x20] sm:$0xff] %v1789_v4  ;;  %v1317_v63 = vpop.f32.mrf.mxu3  ;;  %v1429_v4 = vpop.f32.mrf.mxu0 }
 0x284   : > { %v1318_v55 = vadd.f32 %v1317_v63, %v3256_v38  ;;  %v1624_v28 = vpop.f32.mrf.mxu2 }
 0x285   : > { %v1625_v36 = vadd.f32 %v1624_v28, %v1536_v5  ;;  %v1538_v48 = vpop.f32.mrf.mxu1 }
 0x286   : > { %v1407_v12 = vadd.f32 %v3220_v51, %v1318_v55  ;;  %v1539_v46 = vadd.f32 %v1538_v48, %v3113_v29 }
 0x287   : > { %vm1696_vm7 = vcmp.ge.f32.partialorder %v1625_v36, 0.0  ;;  %v1760_v47 = vmul.f32 0.01, %v1625_v36 }
 0x288   : > { %vm1663_vm8 = vcmp.ge.f32.partialorder %v1407_v12, 0.0  ;;  %v1727_v62 = vmul.f32 0.01, %v1407_v12  ;;  %1359 = vmatmul.bf16.gmra.mxu3 %v3154_v61 }
 0x289   : > { %v1824_v33 = vsel %vm1696_vm7, %v1625_v36, %v1760_v47 }
 0x28a   : > { %v1791_v60 = vsel %vm1663_vm8, %v1407_v12, %v1727_v62  ;;  %1888 = vst [vmem:[%s3131_s16 + $0x138] sm:$0xff] %v1824_v33 }
 0x28b   : > { %1855 = vst [vmem:[%s3131_s16 + $0x30] sm:$0xff] %v1791_v60  ;;  %v1320_v2 = vpop.f32.mrf.mxu3  ;;  %v3315_v47 = vpop.f32.mrf.mxu0 }
 0x28c   : > { %v1321_v53 = vadd.f32 %v1320_v2, %v3256_v38  ;;  %v1627_v51 = vpop.f32.mrf.mxu2 }
 0x28d   : > { %v1628_v58 = vadd.f32 %v1627_v51, %v1539_v46  ;;  %v1540_v56 = vpop.f32.mrf.mxu1 }
 0x28e   : > { %v1410_v31 = vadd.f32 %v3232_v50, %v1321_v53  ;;  %v1541_v41 = vadd.f32 %v1540_v56, %v3113_v29 }
 0x28f   : > { %vm1698_vm9 = vcmp.ge.f32.partialorder %v1628_v58, 0.0  ;;  %v1762_v61 = vmul.f32 0.01, %v1628_v58 }
 0x290   : > { %vm1665_vm10 = vcmp.ge.f32.partialorder %v1410_v31, 0.0  ;;  %v1729_v26 = vmul.f32 0.01, %v1410_v31 }
 0x291   : > { %v1826_v27 = vsel %vm1698_vm9, %v1628_v58, %v1762_v61 }
 0x292   : > { %v1793_v1 = vsel %vm1665_vm10, %v1410_v31, %v1729_v26  ;;  %1890 = vst [vmem:[%s3131_s16 + $0x148] sm:$0xff] %v1826_v27 }
 0x293   : > { %1857 = vst [vmem:[%s3131_s16 + $0x40] sm:$0xff] %v1793_v1  ;;  %v1322_v3 = vpop.f32.mrf.mxu3  ;;  %v3323_v51 = vpop.f32.mrf.mxu0 }
 0x294   : > { %v1323_v9 = vadd.f32 %v1322_v3, %v3256_v38  ;;  %v1629_v54 = vpop.f32.mrf.mxu2 }
 0x295   : > { %v1630_v0 = vadd.f32 %v1629_v54, %v1541_v41  ;;  %v1543_v39 = vpop.f32.mrf.mxu1 }
 0x296   : > { %v1412_v50 = vadd.f32 %v3242_v42, %v1323_v9  ;;  %v1544_v18 = vadd.f32 %v1543_v39, %v3113_v29 }
 0x297   : > { %vm1700_vm11 = vcmp.ge.f32.partialorder %v1630_v0, 0.0  ;;  %v1764_v57 = vmul.f32 0.01, %v1630_v0 }
 0x298   : > { %vm1667_vm12 = vcmp.ge.f32.partialorder %v1412_v50, 0.0  ;;  %v1731_v8 = vmul.f32 0.01, %v1412_v50  ;;  %1364 = vmatmul.bf16.gmra.mxu3 %v3171_v19 }
 0x299   : > { %v1828_v10 = vsel %vm1700_vm11, %v1630_v0, %v1764_v57 }
 0x29a   : > { %v1795_v20 = vsel %vm1667_vm12, %v1412_v50, %v1731_v8  ;;  %1892 = vst [vmem:[%s3131_s16 + $0x158] sm:$0xff] %v1828_v10 }
 0x29b   : > { %1859 = vst [vmem:[%s3131_s16 + $0x50] sm:$0xff] %v1795_v20  ;;  %v1325_v7 = vpop.f32.mrf.mxu3  ;;  %v3332_v0 = vpop.f32.mrf.mxu0 }
 0x29c   : > { %v1326_v13 = vadd.f32 %v1325_v7, %v3256_v38  ;;  %v1632_v59 = vpop.f32.mrf.mxu2 }
 0x29d   : > { %v1633_v42 = vadd.f32 %v1632_v59, %v1544_v18  ;;  %v1545_v44 = vpop.f32.mrf.mxu1 }
 0x29e   : > { %v1415_v16 = vadd.f32 %v3249_v43, %v1326_v13  ;;  %v1546_v25 = vadd.f32 %v1545_v44, %v3113_v29 }
 0x29f   : > { %vm1702_vm13 = vcmp.ge.f32.partialorder %v1633_v42, 0.0  ;;  %v1766_v24 = vmul.f32 0.01, %v1633_v42 }
 0x2a0   : > { %vm1669_vm14 = vcmp.ge.f32.partialorder %v1415_v16, 0.0  ;;  %v1733_v19 = vmul.f32 0.01, %v1415_v16 }
 0x2a1   : > { %v1830_v22 = vsel %vm1702_vm13, %v1633_v42, %v1766_v24 }
 0x2a2   : > { %v1797_v52 = vsel %vm1669_vm14, %v1415_v16, %v1733_v19  ;;  %1894 = vst [vmem:[%s3131_s16 + $0x168] sm:$0xff] %v1830_v22 }
 0x2a3   : > { %1861 = vst [vmem:[%s3131_s16 + $0x60] sm:$0xff] %v1797_v52  ;;  %v1327_v49 = vpop.f32.mrf.mxu3 }
 0x2a4   : > { %v1328_v37 = vadd.f32 %v1327_v49, %v3256_v38  ;;  %v1634_v17 = vpop.f32.mrf.mxu2 }
 0x2a5   : > { %v1635_v43 = vadd.f32 %v1634_v17, %v1546_v25  ;;  %v1548_v28 = vpop.f32.mrf.mxu1 }
 0x2a6   : > { %v1417_v35 = vadd.f32 %v3259_v11, %v1328_v37  ;;  %v1549_v58 = vadd.f32 %v1548_v28, %v3113_v29 }
 0x2a7   : > { %vm1704_vm15 = vcmp.ge.f32.partialorder %v1635_v43, 0.0  ;;  %v1768_v45 = vmul.f32 0.01, %v1635_v43 }
 0x2a8   : > { %vm1671_vm0 = vcmp.ge.f32.partialorder %v1417_v35, 0.0  ;;  %v1735_v30 = vmul.f32 0.01, %v1417_v35  ;;  %1369 = vmatmul.bf16.gmra.mxu3 %v3190_v14 }
 0x2a9   : > { %v1832_v5 = vsel %vm1704_vm15, %v1635_v43, %v1768_v45 }
 0x2aa   : > { %v1799_v63 = vsel %vm1671_vm0, %v1417_v35, %v1735_v30  ;;  %1896 = vst [vmem:[%s3131_s16 + $0x178] sm:$0xff] %v1832_v5 }
 0x2ab   : > { %1863 = vst [vmem:[%s3131_s16 + $0x70] sm:$0xff] %v1799_v63  ;;  %v1330_v55 = vpop.f32.mrf.mxu3 }
 0x2ac   : > { %v1331_v36 = vadd.f32 %v1330_v55, %v3256_v38 }
 0x2ad   : > { %v1550_v33 = vpop.f32.mrf.mxu1 }
 0x2ae   : > { %v1420_v48 = vadd.f32 %v3275_v23, %v1331_v36  ;;  %v1551_v9 = vadd.f32 %v1550_v33, %v3113_v29 }
 0x2b0   : > { %vm1673_vm1 = vcmp.ge.f32.partialorder %v1420_v48, 0.0  ;;  %v1737_v11 = vmul.f32 0.01, %v1420_v48 }
 0x2b2   : > { %v1801_v12 = vsel %vm1673_vm1, %v1420_v48, %v1737_v11 }
 0x2b3   : > { %1865 = vst [vmem:[%s3131_s16 + $0x80] sm:$0xff] %v1801_v12  ;;  %v1332_v62 = vpop.f32.mrf.mxu3 }
 0x2b4   : > { %v1333_v14 = vadd.f32 %v1332_v62, %v3256_v38 }
 0x2b6   : > { %v1422_v60 = vadd.f32 %v3284_v21, %v1333_v14  ;;  %v1553_v21 = vpop.f32.mrf.mxu1 }
 0x2b7   : > { %v1554_v13 = vadd.f32 %v1553_v21, %v3113_v29 }
 0x2b8   : > { %vm1675_vm2 = vcmp.ge.f32.partialorder %v1422_v60, 0.0  ;;  %v1739_v46 = vmul.f32 0.01, %v1422_v60  ;;  %1374 = vmatmul.bf16.gmra.mxu3 %v3206_v34 }
 0x2ba   : > { %v1803_v2 = vsel %vm1675_vm2, %v1422_v60, %v1739_v46 }
 0x2bb   : > { %1867 = vst [vmem:[%s3131_s16 + $0x90] sm:$0xff] %v1803_v2  ;;  %v1335_v23 = vpop.f32.mrf.mxu3 }
 0x2bc   : > { %v1336_v53 = vadd.f32 %v1335_v23, %v3256_v38 }
 0x2be   : > { %v1425_v56 = vadd.f32 %v3294_v15, %v1336_v53  ;;  %v1637_v31 = vpop.f32.mrf.mxu2  ;;  %v1555_v8 = vpop.f32.mrf.mxu1 }
 0x2bf   : > { %v1638_v61 = vadd.f32 %v1637_v31, %v1549_v58  ;;  %v1556_v49 = vadd.f32 %v1555_v8, %v3113_v29 }
 0x2c0   : > { %vm1677_vm3 = vcmp.ge.f32.partialorder %v1425_v56, 0.0  ;;  %v1741_v26 = vmul.f32 0.01, %v1425_v56 }
 0x2c1   : > { %vm1706_vm4 = vcmp.ge.f32.partialorder %v1638_v61, 0.0  ;;  %v1770_v34 = vmul.f32 0.01, %v1638_v61 }
 0x2c2   : > { %v1805_v27 = vsel %vm1677_vm3, %v1425_v56, %v1741_v26 }
 0x2c3   : > { %1869 = vst [vmem:[%s3131_s16 + $0xa0] sm:$0xff] %v1805_v27  ;;  %v1834_v1 = vsel %vm1706_vm4, %v1638_v61, %v1770_v34  ;;  %v1337_v41 = vpop.f32.mrf.mxu3 }
 0x2c4   : > { %1898 = vst [vmem:[%s3131_s16 + $0x188] sm:$0xff] %v1834_v1  ;;  %v1338_v3 = vadd.f32 %v1337_v41, %v3256_v38 }
 0x2c6   : > { %v1427_v54 = vadd.f32 %v3303_v40, %v1338_v3  ;;  %v1639_v15 = vpop.f32.mrf.mxu2  ;;  %v1558_v52 = vpop.f32.mrf.mxu1 }
 0x2c7   : > { %v1640_v50 = vadd.f32 %v1639_v15, %v1551_v9  ;;  %v1559_v28 = vadd.f32 %v1558_v52, %v3113_v29 }
 0x2c8   : > { %vm1679_vm5 = vcmp.ge.f32.partialorder %v1427_v54, 0.0  ;;  %v1743_v39 = vmul.f32 0.01, %v1427_v54  ;;  %1379 = vmatmul.bf16.gmra.mxu3 %v3224_v6  ;;  %v1439_v6 = vpop.f32.mrf.mxu0 }
 0x2c9   : > { %vm1708_vm6 = vcmp.ge.f32.partialorder %v1640_v50, 0.0  ;;  %v1772_v57 = vmul.f32 0.01, %v1640_v50 }
 0x2ca   : > { %v1807_v10 = vsel %vm1679_vm5, %v1427_v54, %v1743_v39 }
 0x2cb   : > { %1871 = vst [vmem:[%s3131_s16 + $0xb0] sm:$0xff] %v1807_v10  ;;  %v1836_v20 = vsel %vm1708_vm6, %v1640_v50, %v1772_v57  ;;  %v1340_v18 = vpop.f32.mrf.mxu3 }
 0x2cc   : > { %1900 = vst [vmem:[%s3131_s16 + $0x198] sm:$0xff] %v1836_v20  ;;  %v1341_v7 = vadd.f32 %v1340_v18, %v3256_v38 }
 0x2ce   : > { %v1430_v59 = vadd.f32 %v1429_v4, %v1341_v7  ;;  %v1642_v42 = vpop.f32.mrf.mxu2  ;;  %v1560_v36 = vpop.f32.mrf.mxu1 }
 0x2cf   : > { %v1643_v16 = vadd.f32 %v1642_v42, %v1554_v13  ;;  %v1561_v2 = vadd.f32 %v1560_v36, %v3113_v29 }
 0x2d0   : > { %vm1681_vm7 = vcmp.ge.f32.partialorder %v1430_v59, 0.0  ;;  %v1745_v40 = vmul.f32 0.01, %v1430_v59  ;;  %v1441_v4 = vpop.f32.mrf.mxu0 }
 0x2d1   : > { %vm1710_vm8 = vcmp.ge.f32.partialorder %v1643_v16, 0.0  ;;  %v1774_v24 = vmul.f32 0.01, %v1643_v16 }
 0x2d2   : > { %v1809_v19 = vsel %vm1681_vm7, %v1430_v59, %v1745_v40 }
 0x2d3   : > { %1873 = vst [vmem:[%s3131_s16 + $0xc0] sm:$0xff] %v1809_v19  ;;  %v1838_v44 = vsel %vm1710_vm8, %v1643_v16, %v1774_v24  ;;  %v1342_v22 = vpop.f32.mrf.mxu3 }
 0x2d4   : > { %1902 = vst [vmem:[%s3131_s16 + $0x1a8] sm:$0xff] %v1838_v44  ;;  %v1343_v25 = vadd.f32 %v1342_v22, %v3256_v38 }
 0x2d6   : > { %v1432_v37 = vadd.f32 %v3315_v47, %v1343_v25  ;;  %v1644_v17 = vpop.f32.mrf.mxu2  ;;  %v1563_v58 = vpop.f32.mrf.mxu1 }
 0x2d7   : > { %v1645_v43 = vadd.f32 %v1644_v17, %v1556_v49  ;;  %v1564_v27 = vadd.f32 %v1563_v58, %v3113_v29 }
 0x2d8   : > { %vm1683_vm9 = vcmp.ge.f32.partialorder %v1432_v37, 0.0  ;;  %v1747_v35 = vmul.f32 0.01, %v1432_v37  ;;  %1384 = vmatmul.bf16.gmra.mxu3 %v3240_v32  ;;  %v1444_v46 = vpop.f32.mrf.mxu0 }
 0x2d9   : > { %vm1712_vm10 = vcmp.ge.f32.partialorder %v1645_v43, 0.0  ;;  %v1776_v45 = vmul.f32 0.01, %v1645_v43 }
 0x2da   : > { %v1811_v30 = vsel %vm1683_vm9, %v1432_v37, %v1747_v35 }
 0x2db   : > { %1875 = vst [vmem:[%s3131_s16 + $0xd0] sm:$0xff] %v1811_v30  ;;  %v1840_v5 = vsel %vm1712_vm10, %v1645_v43, %v1776_v45  ;;  %v1345_v63 = vpop.f32.mrf.mxu3 }
 0x2dc   : > { %1904 = vst [vmem:[%s3131_s16 + $0x1b8] sm:$0xff] %v1840_v5  ;;  %v1346_v55 = vadd.f32 %v1345_v63, %v3256_v38 }
 0x2de   : > { %v1435_v48 = vadd.f32 %v3323_v51, %v1346_v55  ;;  %v1647_v11 = vpop.f32.mrf.mxu2 }
 0x2df   : > { %v1648_v12 = vadd.f32 %v1647_v11, %v1559_v28 }
 0x2e0   : > { %vm1685_vm11 = vcmp.ge.f32.partialorder %v1435_v48, 0.0  ;;  %v1749_v32 = vmul.f32 0.01, %v1435_v48  ;;  %v1446_v3 = vpop.f32.mrf.mxu0 }
 0x2e1   : > { %vm1714_vm12 = vcmp.ge.f32.partialorder %v1648_v12, 0.0  ;;  %v1778_v47 = vmul.f32 0.01, %v1648_v12 }
 0x2e2   : > { %v1813_v62 = vsel %vm1685_vm11, %v1435_v48, %v1749_v32 }
 0x2e3   : > { %1877 = vst [vmem:[%s3131_s16 + $0xe0] sm:$0xff] %v1813_v62  ;;  %v1842_v14 = vsel %vm1714_vm12, %v1648_v12, %v1778_v47  ;;  %v1347_v33 = vpop.f32.mrf.mxu3 }
 0x2e4   : > { %1906 = vst [vmem:[%s3131_s16 + $0x1c8] sm:$0xff] %v1842_v14  ;;  %v1348_v60 = vadd.f32 %v1347_v33, %v3256_v38 }
 0x2e6   : > { %v1437_v23 = vadd.f32 %v3332_v0, %v1348_v60  ;;  %v1649_v53 = vpop.f32.mrf.mxu2  ;;  %v1565_v0 = vpop.f32.mrf.mxu1 }
 0x2e7   : > { %v1650_v51 = vadd.f32 %v1649_v53, %v1561_v2  ;;  %v1566_v10 = vadd.f32 %v1565_v0, %v3113_v29 }
 0x2e8   : > { %vm1687_vm13 = vcmp.ge.f32.partialorder %v1437_v23, 0.0  ;;  %v1751_v56 = vmul.f32 0.01, %v1437_v23  ;;  %v1449_v59 = vpop.f32.mrf.mxu0 }
 0x2e9   : > { %vm1716_vm14 = vcmp.ge.f32.partialorder %v1650_v51, 0.0  ;;  %v1780_v31 = vmul.f32 0.01, %v1650_v51 }
 0x2ea   : > { %v1815_v61 = vsel %vm1687_vm13, %v1437_v23, %v1751_v56 }
 0x2eb   : > { %1879 = vst [vmem:[%s3131_s16 + $0xf0] sm:$0xff] %v1815_v61  ;;  %v1844_v21 = vsel %vm1716_vm14, %v1650_v51, %v1780_v31  ;;  %v1350_v26 = vpop.f32.mrf.mxu3 }
 0x2ec   : > { %1908 = vst [vmem:[%s3131_s16 + $0x1d8] sm:$0xff] %v1844_v21  ;;  %v1351_v34 = vadd.f32 %v1350_v26, %v3256_v38 }
 0x2ee   : > { %v1440_v1 = vadd.f32 %v1439_v6, %v1351_v34  ;;  %v1652_v41 = vpop.f32.mrf.mxu2 }
 0x2ef   : > { %v1653_v9 = vadd.f32 %v1652_v41, %v1564_v27 }
 0x2f0   : > { %vm1689_vm15 = vcmp.ge.f32.partialorder %v1440_v1, 0.0  ;;  %v1753_v54 = vmul.f32 0.01, %v1440_v1  ;;  %v1451_v22 = vpop.f32.mrf.mxu0 }
 0x2f1   : > { %vm1718_vm0 = vcmp.ge.f32.partialorder %v1653_v9, 0.0  ;;  %v1782_v15 = vmul.f32 0.01, %v1653_v9 }
 0x2f2   : > { %v1817_v50 = vsel %vm1689_vm15, %v1440_v1, %v1753_v54 }
 0x2f3   : > { %1881 = vst [vmem:[%s3131_s16 + $0x100] sm:$0xff] %v1817_v50  ;;  %v1846_v39 = vsel %vm1718_vm0, %v1653_v9, %v1782_v15  ;;  %v1352_v57 = vpop.f32.mrf.mxu3 }
 0x2f4   : > { %1910 = vst [vmem:[%s3131_s16 + $0x1e8] sm:$0xff] %v1846_v39  ;;  %v1353_v8 = vadd.f32 %v1352_v57, %v3256_v38 }
 0x2f6   : > { %v1442_v20 = vadd.f32 %v1441_v4, %v1353_v8  ;;  %v1654_v18 = vpop.f32.mrf.mxu2 }
 0x2f7   : > { %v1655_v7 = vadd.f32 %v1654_v18, %v1566_v10 }
 0x2f8   : > { %vm1691_vm1 = vcmp.ge.f32.partialorder %v1442_v20, 0.0  ;;  %v1755_v13 = vmul.f32 0.01, %v1442_v20  ;;  %v1454_v45 = vpop.f32.mrf.mxu0 }
 0x2f9   : > { %vm1720_vm2 = vcmp.ge.f32.partialorder %v1655_v7, 0.0  ;;  %v1784_v42 = vmul.f32 0.01, %v1655_v7 }
 0x2fa   : > { %v1819_v16 = vsel %vm1691_vm1, %v1442_v20, %v1755_v13 }
 0x2fb   : > { %1883 = vst [vmem:[%s3131_s16 + $0x110] sm:$0xff] %v1819_v16  ;;  %v1848_v40 = vsel %vm1720_vm2, %v1655_v7, %v1784_v42  ;;  %v1355_v6 = vpop.f32.mrf.mxu3 }
 0x2fc   : > { %1912 = vst [vmem:[%s3131_s16 + $0x1f8] sm:$0xff] %v1848_v40  ;;  %v1356_v24 = vadd.f32 %v1355_v6, %v3256_v38 }
 0x2fe   : > { %v1445_v19 = vadd.f32 %v1444_v46, %v1356_v24 }
 0x300   : > { %vm1693_vm3 = vcmp.ge.f32.partialorder %v1445_v19, 0.0  ;;  %v1757_v29 = vmul.f32 0.01, %v1445_v19  ;;  %v1456_v36 = vpop.f32.mrf.mxu0 }
 0x302   : > { %v1821_v44 = vsel %vm1693_vm3, %v1445_v19, %v1757_v29 }
 0x303   : > { %1885 = vst [vmem:[%s3131_s16 + $0x120] sm:$0xff] %v1821_v44  ;;  %v1357_v52 = vpop.f32.mrf.mxu3 }
 0x304   : > { %v1358_v25 = vadd.f32 %v1357_v52, %v3256_v38 }
 0x306   : > { %v1447_v49 = vadd.f32 %v1446_v3, %v1358_v25 }
 0x308   : > { %vm1695_vm4 = vcmp.ge.f32.partialorder %v1447_v49, 0.0  ;;  %v1759_v37 = vmul.f32 0.01, %v1447_v49  ;;  %v1459_v62 = vpop.f32.mrf.mxu0 }
 0x30a   : > { %v1823_v17 = vsel %vm1695_vm4, %v1447_v49, %v1759_v37 }
 0x30b   : > { %1887 = vst [vmem:[%s3131_s16 + $0x130] sm:$0xff] %v1823_v17  ;;  %v1360_v43 = vpop.f32.mrf.mxu3 }
 0x30c   : > { %v1361_v35 = vadd.f32 %v1360_v43, %v3256_v38 }
 0x30e   : > { %v1450_v30 = vadd.f32 %v1449_v59, %v1361_v35 }
 0x310   : > { %vm1697_vm5 = vcmp.ge.f32.partialorder %v1450_v30, 0.0  ;;  %v1761_v4 = vmul.f32 0.01, %v1450_v30  ;;  %v1461_v53 = vpop.f32.mrf.mxu0 }
 0x312   : > { %v1825_v5 = vsel %vm1697_vm5, %v1450_v30, %v1761_v4 }
 0x313   : > { %1889 = vst [vmem:[%s3131_s16 + $0x140] sm:$0xff] %v1825_v5  ;;  %v1362_v63 = vpop.f32.mrf.mxu3 }
 0x314   : > { %v1363_v55 = vadd.f32 %v1362_v63, %v3256_v38 }
 0x316   : > { %v1452_v28 = vadd.f32 %v1451_v22, %v1363_v55 }
 0x318   : > { %vm1699_vm6 = vcmp.ge.f32.partialorder %v1452_v28, 0.0  ;;  %v1763_v48 = vmul.f32 0.01, %v1452_v28  ;;  %v1464_v26 = vpop.f32.mrf.mxu0 }
 0x31a   : > { %v1827_v11 = vsel %vm1699_vm6, %v1452_v28, %v1763_v48 }
 0x31b   : > { %1891 = vst [vmem:[%s3131_s16 + $0x150] sm:$0xff] %v1827_v11  ;;  %v1365_v12 = vpop.f32.mrf.mxu3 }
 0x31c   : > { %v1366_v32 = vadd.f32 %v1365_v12, %v3256_v38 }
 0x31e   : > { %v1455_v47 = vadd.f32 %v1454_v45, %v1366_v32 }
 0x320   : > { %vm1701_vm7 = vcmp.ge.f32.partialorder %v1455_v47, 0.0  ;;  %v1765_v14 = vmul.f32 0.01, %v1455_v47  ;;  %v1466_v15 = vpop.f32.mrf.mxu0 }
 0x322   : > { %v1829_v33 = vsel %vm1701_vm7, %v1455_v47, %v1765_v14 }
 0x323   : > { %1893 = vst [vmem:[%s3131_s16 + $0x160] sm:$0xff] %v1829_v33  ;;  %v1367_v60 = vpop.f32.mrf.mxu3 }
 0x324   : > { %v1368_v46 = vadd.f32 %v1367_v60, %v3256_v38 }
 0x326   : > { %v1457_v2 = vadd.f32 %v1456_v36, %v1368_v46 }
 0x328   : > { %vm1703_vm8 = vcmp.ge.f32.partialorder %v1457_v2, 0.0  ;;  %v1767_v23 = vmul.f32 0.01, %v1457_v2  ;;  %v1469_v20 = vpop.f32.mrf.mxu0 }
 0x32a   : > { %v1831_v51 = vsel %vm1703_vm8, %v1457_v2, %v1767_v23 }
 0x32b   : > { %1895 = vst [vmem:[%s3131_s16 + $0x170] sm:$0xff] %v1831_v51  ;;  %v1370_v58 = vpop.f32.mrf.mxu3 }
 0x32c   : > { %v1371_v56 = vadd.f32 %v1370_v58, %v3256_v38 }
 0x32e   : > { %v1460_v31 = vadd.f32 %v1459_v62, %v1371_v56 }
 0x330   : > { %vm1705_vm9 = vcmp.ge.f32.partialorder %v1460_v31, 0.0  ;;  %v1769_v61 = vmul.f32 0.01, %v1460_v31  ;;  %v1471_v40 = vpop.f32.mrf.mxu0 }
 0x332   : > { %v1833_v21 = vsel %vm1705_vm9, %v1460_v31, %v1769_v61 }
 0x333   : > { %1897 = vst [vmem:[%s3131_s16 + $0x180] sm:$0xff] %v1833_v21  ;;  %v1372_v34 = vpop.f32.mrf.mxu3 }
 0x334   : > { %v1373_v27 = vadd.f32 %v1372_v34, %v3256_v38 }
 0x336   : > { %v1462_v1 = vadd.f32 %v1461_v53, %v1373_v27 }
 0x338   : > { %vm1707_vm10 = vcmp.ge.f32.partialorder %v1462_v1, 0.0  ;;  %v1771_v41 = vmul.f32 0.01, %v1462_v1  ;;  %v1474_v52 = vpop.f32.mrf.mxu0 }
 0x33a   : > { %v1835_v3 = vsel %vm1707_vm10, %v1462_v1, %v1771_v41 }
 0x33b   : > { %1899 = vst [vmem:[%s3131_s16 + $0x190] sm:$0xff] %v1835_v3  ;;  %v1375_v9 = vpop.f32.mrf.mxu3 }
 0x33c   : > { %v1376_v54 = vadd.f32 %v1375_v9, %v3256_v38 }
 0x33e   : > { %v1465_v0 = vadd.f32 %v1464_v26, %v1376_v54 }
 0x340   : > { %vm1709_vm11 = vcmp.ge.f32.partialorder %v1465_v0, 0.0  ;;  %v1773_v50 = vmul.f32 0.01, %v1465_v0  ;;  %v1476_v30 = vpop.f32.mrf.mxu0 }
 0x342   : > { %v1837_v39 = vsel %vm1709_vm11, %v1465_v0, %v1773_v50 }
 0x343   : > { %1901 = vst [vmem:[%s3131_s16 + $0x1a0] sm:$0xff] %v1837_v39  ;;  %v1377_v57 = vpop.f32.mrf.mxu3 }
 0x344   : > { %v1378_v8 = vadd.f32 %v1377_v57, %v3256_v38 }
 0x346   : > { %v1467_v10 = vadd.f32 %v1466_v15, %v1378_v8 }
 0x348   : > { %vm1711_vm12 = vcmp.ge.f32.partialorder %v1467_v10, 0.0  ;;  %v1775_v18 = vmul.f32 0.01, %v1467_v10 }
 0x34a   : > { %v1839_v7 = vsel %vm1711_vm12, %v1467_v10, %v1775_v18 }
 0x34b   : > { %1903 = vst [vmem:[%s3131_s16 + $0x1b0] sm:$0xff] %v1839_v7  ;;  %v1380_v13 = vpop.f32.mrf.mxu3 }
 0x34c   : > { %v1381_v59 = vadd.f32 %v1380_v13, %v3256_v38 }
 0x34e   : > { %v1470_v42 = vadd.f32 %v1469_v20, %v1381_v59 }
 0x350   : > { %vm1713_vm13 = vcmp.ge.f32.partialorder %v1470_v42, 0.0  ;;  %v1777_v16 = vmul.f32 0.01, %v1470_v42 }
 0x352   : > { %v1841_v6 = vsel %vm1713_vm13, %v1470_v42, %v1777_v16 }
 0x353   : > { %1905 = vst [vmem:[%s3131_s16 + $0x1c0] sm:$0xff] %v1841_v6  ;;  %v1382_v24 = vpop.f32.mrf.mxu3 }
 0x354   : > { %v1383_v19 = vadd.f32 %v1382_v24, %v3256_v38 }
 0x356   : > { %v1472_v29 = vadd.f32 %v1471_v40, %v1383_v19 }
 0x358   : > { %vm1715_vm14 = vcmp.ge.f32.partialorder %v1472_v29, 0.0  ;;  %v1779_v44 = vmul.f32 0.01, %v1472_v29 }
 0x35a   : > { %v1843_v22 = vsel %vm1715_vm14, %v1472_v29, %v1779_v44 }
 0x35b   : > { %1907 = vst [vmem:[%s3131_s16 + $0x1d0] sm:$0xff] %v1843_v22  ;;  %v1385_v25 = vpop.f32.mrf.mxu3 }
 0x35c   : > { %v1386_v49 = vadd.f32 %v1385_v25, %v3256_v38 }
 0x35e   : > { %v1475_v37 = vadd.f32 %v1474_v52, %v1386_v49 }
 0x360   : > { %vm1717_vm15 = vcmp.ge.f32.partialorder %v1475_v37, 0.0  ;;  %v1781_v17 = vmul.f32 0.01, %v1475_v37 }
 0x362   : > { %v1845_v43 = vsel %vm1717_vm15, %v1475_v37, %v1781_v17 }
 0x363   : > { %1909 = vst [vmem:[%s3131_s16 + $0x1e0] sm:$0xff] %v1845_v43  ;;  %v1387_v35 = vpop.f32.mrf.mxu3 }
 0x364   : > { %v1388_v45 = vadd.f32 %v1387_v35, %v3256_v38 }
 0x366   : > { %v1477_v4 = vadd.f32 %v1476_v30, %v1388_v45 }
 0x368   : > { %vm1719_vm0 = vcmp.ge.f32.partialorder %v1477_v4, 0.0  ;;  %v1783_v5 = vmul.f32 0.01, %v1477_v4 }
 0x36a   : > { %v1847_v63 = vsel %vm1719_vm0, %v1477_v4, %v1783_v5 }
 0x36b   : > { %1911 = vst [vmem:[%s3131_s16 + $0x1f0] sm:$0xff] %v1847_v63 }
 0x36c   : > { %2360 = shalt.err (!%p2357_p3)
}
 0x36d   : > { %s2397_s14 = smov 256   ;;  %s2398_s16 = smov 16  }
 0x36e   : > { %2291 = dma.vmem_to_hbm [thread:$0]  (%p2477_p5), %s1928_s22, 8192, %s1930_s21, %s1914_s28, %s2397_s14, %s2397_s14, %s2398_s16  }
 0x36f PF: > { %p2297_p4 = scmp.ge.s32.totalorder %s2395_s27, 2  ;;  %s1944_s18 = sand.u32 1, %s2383_s24  }
 0x370   : > { %s1945_s19 = scalar_lea.sflag [#allocation3], %s1944_s18 }
 0x371   : > { %p2294_p7 = pnand %p2297_p4, %p2481_p6 }
 0x373   : > { %p2295_p8 = pneg %p2294_p7 }
 0x375   : > { %2378 = dma.done.wait (%p2295_p8), %s1945_s19, 8192  }
 0x376   : > { %2380 = vsyncadd (%p2295_p8), %s1945_s19, 4294959104  ;;  %p17_p9 = scmp.ge.s32.totalorder %s2464_s30, 6   ;;  %s3437_s24 = smov %s2387_s25 }
 0x377   : > { %s3438_s25 = smov %s2391_s26  ;;  %s3439_s26 = smov %s2475_s10 }
 0x378   : > { %s3440_s27 = smov %s2464_s30  ;;  %19 = sbr.rel (!%p17_p9) target bundleno = 3 (0x3), region = 83 }
 0x37d   :  { %1951 = vsyncpa [#allocation3], 1 }
 0x37e   :  { %1953 = vsyncpa [#allocation3 + $0x1], 1 }

</bundles_post_ra>
